<compile_context>
chip_gen: v7x
topology: tpu7x:2x2x1
jax: 0.10.0
libtpu: 0.0.40
codegen_flags: <defaults>
</compile_context>

<pallas_src>
import functools

import jax
import jax.numpy as jnp
import numpy as np
from jax.experimental import pallas as pl
from jax.experimental.pallas import tpu as pltpu

# ---------------- module-consistent hyperparameters ----------------
NUM_STATES = 8           # obs dim; last 4 entries are the "pendulum state"
NUM_ACTIONS = 2
SEQ_LEN = 16             # model_config['max_seq_len'] (must be even here)
NUM_OUTPUTS = 6

F_IN = NUM_STATES - 4 + NUM_ACTIONS      # 6   TimeCNN in_feature_dim == flat_in width
INPUT_SIZE = NUM_STATES + NUM_ACTIONS    # 10  _hidden input width
K1, K2 = 5, 5
C_HID = 32                               # inMLP / conv1 channels
C2 = 16                                  # conv2 channels
TH = SEQ_LEN // 2                        # 8   even/odd half length
L1 = (SEQ_LEN - K1) // 2 + 1             # 6   conv1 (stride 2) output length
L2 = L1 - K2 + 1                         # 2   conv2 output length
FLAT = C2 * L2                           # 32  flatten(1) size feeding outMLP
OUT_LANES = 128                          # lane-dense output row width
HD = 128 + NUM_OUTPUTS                   # 134 fused [v1 | logits] head width

assert SEQ_LEN % 2 == 0, "stride-2 even/odd split requires an even max_seq_len"


def _round8(n):
    return -(-n // 8) * 8


# ---------- single lane-packed weight slab: name -> (row, lane, nrows, nlanes) ----------
SLAB_LANES = 256
SLAB_ROWS = 400
LAYOUT = {
    "w_h2":  (0,   0,   256, 128),
    "w_v2":  (0,   128, 128, 128),
    "w_c1":  (128, 136, K1 * C_HID, C_HID),   # tap-major conv1 weight
    "w_c2":  (128, 168, K2 * C_HID, C2),      # tap-major conv2 weight
    "w_v3":  (128, 184, 128, 1),
    "w_in2": (128, 192, C_HID, C_HID),
    "w_o1":  (160, 192, FLAT, C_HID),
    "w_in1": (192, 192, F_IN, C_HID),
    "w_o2":  (200, 192, C_HID, 4),
    "w_hd":  (256, 0,   128, HD),             # fused [w_v1 | w_lg]
    "w_h1":  (384, 0,   INPUT_SIZE, 256),     # merged h1: rows 0:6 flat_in, rows 6:10 est
    "b_h1":  (394, 0,   1, 256),
    "b_hd":  (395, 0,   1, HD),               # fused [b_v1 | b_lg]
    "b_h2":  (396, 0,   1, 128),
    "b_v2":  (396, 128, 1, 128),
    "b_in1": (397, 0,   1, C_HID),
    "b_in2": (397, 32,  1, C_HID),
    "b_c1":  (397, 64,  1, C_HID),
    "b_c2":  (397, 96,  1, C2),
    "b_o1":  (397, 112, 1, C_HID),
    "b_o2":  (397, 144, 1, 4),
    "b_v3":  (397, 148, 1, 1),
}


def _check_layout():
    occ = np.zeros((SLAB_ROWS, SLAB_LANES), dtype=bool)
    for name, (r, c, nr, nc) in LAYOUT.items():
        assert r + nr <= SLAB_ROWS and c + nc <= SLAB_LANES, name
        assert not occ[r:r + nr, c:c + nc].any(), f"slab overlap at {name}"
        occ[r:r + nr, c:c + nc] = True


_check_layout()


# ------------------------------- kernel -----------------------------------
def cnn_estimator_kernel(x_ref, flat_ref, w_ref, out_ref):
    dot = functools.partial(jnp.dot, preferred_element_type=jnp.float32)

    def g(name):
        r, c, nr, nc = LAYOUT[name]
        return w_ref[r:r + nr, c:c + nc]        # static slab slice

    tb = flat_ref.shape[0]                      # batch tile (multiple of 8)

    # ---- inMLP (two tanh SlimFCs) over all (parity, half-time, batch) rows at once
    x = x_ref[...].reshape(2 * TH * tb, F_IN)
    y = jnp.tanh(dot(x, g("w_in1")) + g("b_in1"))
    y = jnp.tanh(dot(y, g("w_in2")) + g("b_in2"))
    y = y.reshape(2 * TH, tb, C_HID)
    y_even, y_odd = y[:TH], y[TH:]              # times 0,2,4,... / 1,3,5,...

    # ---- Conv1d(32,32,5,stride=2): single im2col push.  Output position l reads input
    #      time 2l+k -> parity k%2, half-index l + k//2; lane-concat the 5 tap windows.
    cols = []
    for k in range(K1):
        src = y_even if k % 2 == 0 else y_odd
        m = k // 2
        cols.append(src[m:m + L1].reshape(L1 * tb, C_HID))
    cat1 = jnp.concatenate(cols, axis=-1)                               # [L1*tb, 160]
    c1 = (dot(cat1, g("w_c1")) + g("b_c1")).reshape(L1, tb, C_HID)

    # ---- Conv1d(32,16,5), stride 1: single im2col push.
    cat2 = jnp.concatenate(
        [c1[k:k + L2].reshape(L2 * tb, C_HID) for k in range(K2)], axis=-1)  # [L2*tb, 160]
    c2 = (dot(cat2, g("w_c2")) + g("b_c2")).reshape(L2, tb, C2)

    # ---- outMLP: PyTorch flatten(1) (NCL order) folded into the pre-permuted w_o1,
    #      so the flatten is just a lane concat of the L2 position blocks.
    flat_cat = jnp.concatenate([c2[l] for l in range(L2)], axis=-1)     # [tb, 32]
    eh = jnp.tanh(dot(flat_cat, g("w_o1")) + g("b_o1"))
    est = dot(eh, g("w_o2")) + g("b_o2")                                # [tb, 4]

    # ---- policy trunk: obs = cat(flat_in, est) -> one [tb,10]@[10,256] push.
    obs = jnp.concatenate([flat_ref[...], est], axis=-1)                # [tb, 10]
    h = jnp.tanh(dot(obs, g("w_h1")) + g("b_h1"))                       # [tb, 256]
    feat = jnp.tanh(dot(h, g("w_h2")) + g("b_h2"))                      # [tb, 128]

    # ---- fused head: one push yields [v1 pre-act | logits].
    hv = dot(feat, g("w_hd")) + g("b_hd")                               # [tb, 134]
    logits = hv[:, 128:128 + NUM_OUTPUTS]
    v = jnp.tanh(hv[:, :128])
    v = jnp.tanh(dot(v, g("w_v2")) + g("b_v2"))
    value = dot(v, g("w_v3")) + g("b_v3")                               # [tb, 1]

    # ---- single unmasked lane-dense store: logits | value | zero pad.
    out_ref[...] = jnp.concatenate(
        [logits, value,
         jnp.zeros((tb, OUT_LANES - NUM_OUTPUTS - 1), jnp.float32)], axis=-1)


# -------------------- one-time parameter preparation -----------------------
def prepare_params(p):
    """PyTorch-layout params -> one lane-packed f32 slab [SLAB_ROWS, SLAB_LANES]."""
    t = {
        "w_in1": p["in1_w"].T, "b_in1": p["in1_b"],
        "w_in2": p["in2_w"].T, "b_in2": p["in2_b"],
        # Conv1d [Cout, Cin, K] -> tap-major [K*Cin, Cout]
        "w_c1": jnp.transpose(p["c1_w"], (2, 1, 0)).reshape(K1 * C_HID, C_HID),
        "b_c1": p["c1_b"],
        "w_c2": jnp.transpose(p["c2_w"], (2, 1, 0)).reshape(K2 * C_HID, C2),
        "b_c2": p["c2_b"],
        # outMLP first weight [32, C2*L2] (flat col = co*L2 + l) -> rows ordered l*C2 + co
        "w_o1": jnp.transpose(p["o1_w"].reshape(C_HID, C2, L2), (2, 1, 0)).reshape(FLAT, C_HID),
        "b_o1": p["o1_b"],
        "w_o2": p["o2_w"].T, "b_o2": p["o2_b"],
        # merged hidden-layer-1 weight: input rows 0:6 act on flat_in, rows 6:10 on est
        "w_h1": p["h1_w"].T, "b_h1": p["h1_b"],
        "w_h2": p["h2_w"].T, "b_h2": p["h2_b"],
        # fused head: [w_v1 | w_lg] -> one push gives v1 pre-act (lanes 0:128) + logits
        "w_hd": jnp.concatenate([p["v1_w"].T, p["lg_w"].T], axis=1),
        "b_hd": jnp.concatenate([p["v1_b"], p["lg_b"]]),
        "w_v2": p["v2_w"].T, "b_v2": p["v2_b"],
        "w_v3": p["v3_w"].T, "b_v3": p["v3_b"],
    }
    slab = jnp.zeros((SLAB_ROWS, SLAB_LANES), jnp.float32)
    for name, (r, c, nr, nc) in LAYOUT.items():
        a = jnp.asarray(t[name], jnp.float32)
        if a.ndim == 1:
            a = a[None, :]
        assert a.shape == (nr, nc), (name, a.shape, (nr, nc))
        slab = slab.at[r:r + nr, c:c + nc].set(a)
    return slab


# ------------------------------ wrapper ------------------------------------
@jax.jit
def cnn_estimator_forward(obs_history, action_history, slab):
    """obs_history: [B, T, NUM_STATES]; action_history: [B, T, NUM_ACTIONS] (float32)."""
    B = obs_history.shape[0]
    TB = min(128, _round8(B))                    # batch tile rows (multiple of 8)
    Bp = -(-B // TB) * TB                        # padded batch, multiple of TB

    # input glue (fused under jit): slice/concat, batch pad, even/odd time de-interleave
    oah = jnp.concatenate(
        [obs_history[:, :, :NUM_STATES - 4], action_history], axis=-1).astype(jnp.float32)
    oah_p = jnp.pad(oah, ((0, Bp - B), (0, 0), (0, 0)))                 # [Bp, T, F_IN]
    x_eo = jnp.stack([oah_p[:, 0::2, :], oah_p[:, 1::2, :]], axis=0)    # [2, Bp, TH, F]
    x3 = jnp.transpose(x_eo, (0, 2, 1, 3)).reshape(2 * TH, Bp, F_IN)    # (parity*TH+t, b, f)
    flat_in = oah_p[:, -1, :]                                           # [Bp, F_IN]

    out = pl.pallas_call(
        cnn_estimator_kernel,
        out_shape=jax.ShapeDtypeStruct((Bp, OUT_LANES), jnp.float32),
        grid=(Bp // TB,),
        in_specs=[
            pl.BlockSpec((2 * TH, TB, F_IN), lambda i: (0, i, 0)),
            pl.BlockSpec((TB, F_IN), lambda i: (i, 0)),
            pl.BlockSpec((SLAB_ROWS, SLAB_LANES), lambda i: (0, 0)),    # resident weights
        ],
        out_specs=pl.BlockSpec((TB, OUT_LANES), lambda i: (i, 0)),
        compiler_params=pltpu.CompilerParams(
            dimension_semantics=("parallel",)),
    )(x3, flat_in, slab)

    logits = out[:B, :NUM_OUTPUTS]
    value = out[:B, NUM_OUTPUTS]                 # value_function().squeeze(1)
    return logits, value


# ------------------------- deterministic params -----------------------------
def init_params(key):
    keys = jax.random.split(key, 32)
    it = iter(keys)

    def xavier(out_d, in_d):  # nn.init.xavier_normal_
        std = (2.0 / (in_d + out_d)) ** 0.5
        return (std * jax.random.normal(next(it), (out_d, in_d))).astype(jnp.float32)

    def zeros(n):
        return jnp.zeros((n,), jnp.float32)

    p = {}
    p["in1_w"], p["in1_b"] = xavier(32, F_IN), zeros(32)
    p["in2_w"], p["in2_b"] = xavier(32, 32), zeros(32)
    # Conv1d weights in PyTorch layout [Cout, Cin, K]
    p["c1_w"] = (jax.random.normal(next(it), (32, 32, K1)) / (32 * K1) ** 0.5).astype(jnp.float32)
    p["c1_b"] = (0.1 * jax.random.normal(next(it), (32,))).astype(jnp.float32)
    p["c2_w"] = (jax.random.normal(next(it), (16, 32, K2)) / (32 * K2) ** 0.5).astype(jnp.float32)
    p["c2_b"] = (0.1 * jax.random.normal(next(it), (16,))).astype(jnp.float32)
    p["o1_w"], p["o1_b"] = xavier(32, FLAT), zeros(32)
    p["o2_w"], p["o2_b"] = xavier(4, 32), zeros(4)
    p["h1_w"], p["h1_b"] = xavier(256, INPUT_SIZE), zeros(256)
    p["h2_w"], p["h2_b"] = xavier(128, 256), zeros(128)
    p["lg_w"], p["lg_b"] = xavier(NUM_OUTPUTS, 128), zeros(NUM_OUTPUTS)
    p["v1_w"], p["v1_b"] = xavier(128, 128), zeros(128)
    p["v2_w"], p["v2_b"] = xavier(128, 128), zeros(128)
    p["v3_w"] = (0.01 * jax.random.normal(next(it), (1, 128))).astype(jnp.float32)  # normc(0.01)-like
    p["v3_b"] = zeros(1)
    return p


# ------------------------- pure-JAX reference -------------------------------
def reference_forward(obs_history, action_history, p):
    with jax.default_matmul_precision("float32"):
        ns = NUM_STATES
        B = obs_history.shape[0]
        oah = jnp.concatenate([obs_history[:, :, :ns - 4], action_history], axis=-1)
        flat_in = oah[:, -1]
        y = jnp.tanh(oah @ p["in1_w"].T + p["in1_b"])
        y = jnp.tanh(y @ p["in2_w"].T + p["in2_b"])                       # [B, T, 32]
        y_ncl = jnp.transpose(y, (0, 2, 1))                               # [B, 32, T]
        c1 = jnp.stack(
            [jnp.einsum("bck,ock->bo", y_ncl[:, :, 2 * l:2 * l + K1], p["c1_w"])
             for l in range(L1)], axis=-1) + p["c1_b"][None, :, None]     # [B, 32, L1]
        c2 = jnp.stack(
            [jnp.einsum("bck,ock->bo", c1[:, :, l:l + K2], p["c2_w"])
             for l in range(L2)], axis=-1) + p["c2_b"][None, :, None]     # [B, 16, L2]
        flat = c2.reshape(B, FLAT)
        eh = jnp.tanh(flat @ p["o1_w"].T + p["o1_b"])
        est = eh @ p["o2_w"].T + p["o2_b"]
        obs = jnp.concatenate([flat_in, est], axis=-1)
        h = jnp.tanh(obs @ p["h1_w"].T + p["h1_b"])
        feat = jnp.tanh(h @ p["h2_w"].T + p["h2_b"])
        logits = feat @ p["lg_w"].T + p["lg_b"]
        v = jnp.tanh(feat @ p["v1_w"].T + p["v1_b"])
        v = jnp.tanh(v @ p["v2_w"].T + p["v2_b"])
        v = v @ p["v3_w"].T + p["v3_b"]
        return logits, v[:, 0]


# TODO(synk): torch.no_grad()/train-mode flags, custom_loss/metrics and RLlib ViewRequirement
# plumbing are host-side training logic with no kernel equivalent; only the use_estimate=True
# forward math is implemented.

if __name__ == "__main__":
    key = jax.random.PRNGKey(0)
    k_obs, k_act, k_p = jax.random.split(key, 3)
    B = 2
    obs_history = jax.random.normal(k_obs, (B, SEQ_LEN, NUM_STATES), jnp.float32)
    action_history = jax.random.normal(k_act, (B, SEQ_LEN, NUM_ACTIONS), jnp.float32)
    params = init_params(k_p)
    slab = prepare_params(params)              # one-time weight relayout + slab packing

    logits, value = cnn_estimator_forward(obs_history, action_history, slab)
    jax.block_until_ready((logits, value))

    ref_logits, ref_value = reference_forward(obs_history, action_history, params)
    assert logits.shape == (B, NUM_OUTPUTS) and value.shape == (B,)
    assert jnp.allclose(logits, ref_logits, atol=1e-3, rtol=1e-3), \
        float(jnp.max(jnp.abs(logits - ref_logits)))
    assert jnp.allclose(value, ref_value, atol=1e-3, rtol=1e-3), \
        float(jnp.max(jnp.abs(value - ref_value)))
    print("KERNEL_OK")
</pallas_src>

<mosaic_0001>
module attributes {stable_mosaic.version = 11 : i64} {
  func.func @cnn_estimator_kernel(%arg0: i32, %arg1: memref<16x8x6xf32, #tpu.memory_space<vmem>>, %arg2: memref<8x6xf32, #tpu.memory_space<vmem>>, %arg3: memref<400x256xf32, #tpu.memory_space<vmem>>, %arg4: memref<8x128xf32, #tpu.memory_space<vmem>>) attributes {dimension_semantics = [#tpu.dimension_semantics<parallel>], iteration_bounds = array<i64: 1>, scalar_prefetch = 0 : i64, scratch_operands = 0 : i64, tpu.core_type = #tpu.core_type<tc>, window_params = [{transform_indices = @transform_0, window_bounds = array<i64: 16, 8, 6>}, {transform_indices = @transform_1, window_bounds = array<i64: 8, 6>}, {pipeline_mode = #tpu.pipeline_mode<synchronous>, transform_indices = @transform_2, window_bounds = array<i64: 400, 256>}, {transform_indices = @transform_3, window_bounds = array<i64: 8, 128>}]} {
    %c0 = arith.constant 0 : index
    %c0_0 = arith.constant 0 : index
    %c0_1 = arith.constant 0 : index
    %0 = vector.load %arg1[%c0, %c0_0, %c0_1] : memref<16x8x6xf32, #tpu.memory_space<vmem>>, vector<16x8x6xf32>
    %1 = vector.shape_cast %0 : vector<16x8x6xf32> to vector<128x6xf32>
    %c192 = arith.constant 192 : index
    %c192_2 = arith.constant 192 : index
    %2 = vector.load %arg3[%c192, %c192_2] : memref<400x256xf32, #tpu.memory_space<vmem>>, vector<6x32xf32>
    %cst = arith.constant dense<0.000000e+00> : vector<128x32xf32>
    %3 = tpu.matmul %1, %2, %cst {dimension_numbers = #tpu.dot_dimension_numbers<[1], [0], [0], [1], [0, 0, 1, 1], [], []>} : vector<128x6xf32>, vector<6x32xf32>, vector<128x32xf32> -> vector<128x32xf32>
    %c397 = arith.constant 397 : index
    %c0_3 = arith.constant 0 : index
    %4 = vector.load %arg3[%c397, %c0_3] : memref<400x256xf32, #tpu.memory_space<vmem>>, vector<1x32xf32>
    %5 = vector.broadcast %4 : vector<1x32xf32> to vector<128x32xf32>
    %6 = arith.addf %3, %5 : vector<128x32xf32>
    %7 = math.tanh %6 : vector<128x32xf32>
    %c128 = arith.constant 128 : index
    %c192_4 = arith.constant 192 : index
    %8 = vector.load %arg3[%c128, %c192_4] : memref<400x256xf32, #tpu.memory_space<vmem>>, vector<32x32xf32>
    %cst_5 = arith.constant dense<0.000000e+00> : vector<128x32xf32>
    %9 = tpu.matmul %7, %8, %cst_5 {dimension_numbers = #tpu.dot_dimension_numbers<[1], [0], [0], [1], [0, 0, 1, 1], [], []>} : vector<128x32xf32>, vector<32x32xf32>, vector<128x32xf32> -> vector<128x32xf32>
    %c397_6 = arith.constant 397 : index
    %c32 = arith.constant 32 : index
    %10 = vector.load %arg3[%c397_6, %c32] : memref<400x256xf32, #tpu.memory_space<vmem>>, vector<1x32xf32>
    %11 = vector.broadcast %10 : vector<1x32xf32> to vector<128x32xf32>
    %12 = arith.addf %9, %11 : vector<128x32xf32>
    %13 = math.tanh %12 : vector<128x32xf32>
    %14 = vector.shape_cast %13 : vector<128x32xf32> to vector<16x8x32xf32>
    %15 = vector.extract_strided_slice %14 {offsets = [0, 0, 0], sizes = [8, 8, 32], strides = [1, 1, 1]} : vector<16x8x32xf32> to vector<8x8x32xf32>
    %16 = vector.extract_strided_slice %14 {offsets = [8, 0, 0], sizes = [8, 8, 32], strides = [1, 1, 1]} : vector<16x8x32xf32> to vector<8x8x32xf32>
    %17 = vector.extract_strided_slice %15 {offsets = [0, 0, 0], sizes = [6, 8, 32], strides = [1, 1, 1]} : vector<8x8x32xf32> to vector<6x8x32xf32>
    %18 = vector.shape_cast %17 : vector<6x8x32xf32> to vector<48x32xf32>
    %19 = vector.extract_strided_slice %16 {offsets = [0, 0, 0], sizes = [6, 8, 32], strides = [1, 1, 1]} : vector<8x8x32xf32> to vector<6x8x32xf32>
    %20 = vector.shape_cast %19 : vector<6x8x32xf32> to vector<48x32xf32>
    %21 = vector.extract_strided_slice %15 {offsets = [1, 0, 0], sizes = [6, 8, 32], strides = [1, 1, 1]} : vector<8x8x32xf32> to vector<6x8x32xf32>
    %22 = vector.shape_cast %21 : vector<6x8x32xf32> to vector<48x32xf32>
    %23 = vector.extract_strided_slice %16 {offsets = [1, 0, 0], sizes = [6, 8, 32], strides = [1, 1, 1]} : vector<8x8x32xf32> to vector<6x8x32xf32>
    %24 = vector.shape_cast %23 : vector<6x8x32xf32> to vector<48x32xf32>
    %25 = vector.extract_strided_slice %15 {offsets = [2, 0, 0], sizes = [6, 8, 32], strides = [1, 1, 1]} : vector<8x8x32xf32> to vector<6x8x32xf32>
    %26 = vector.shape_cast %25 : vector<6x8x32xf32> to vector<48x32xf32>
    %27 = tpu.concatenate %18, %20, %22, %24, %26 in 1 : vector<48x32xf32>, vector<48x32xf32>, vector<48x32xf32>, vector<48x32xf32>, vector<48x32xf32> -> vector<48x160xf32>
    %c128_7 = arith.constant 128 : index
    %c136 = arith.constant 136 : index
    %28 = vector.load %arg3[%c128_7, %c136] : memref<400x256xf32, #tpu.memory_space<vmem>>, vector<160x32xf32>
    %cst_8 = arith.constant dense<0.000000e+00> : vector<48x32xf32>
    %29 = tpu.matmul %27, %28, %cst_8 {dimension_numbers = #tpu.dot_dimension_numbers<[1], [0], [0], [1], [0, 0, 1, 1], [], []>} : vector<48x160xf32>, vector<160x32xf32>, vector<48x32xf32> -> vector<48x32xf32>
    %c397_9 = arith.constant 397 : index
    %c64 = arith.constant 64 : index
    %30 = vector.load %arg3[%c397_9, %c64] : memref<400x256xf32, #tpu.memory_space<vmem>>, vector<1x32xf32>
    %31 = vector.broadcast %30 : vector<1x32xf32> to vector<48x32xf32>
    %32 = arith.addf %29, %31 : vector<48x32xf32>
    %33 = vector.shape_cast %32 : vector<48x32xf32> to vector<6x8x32xf32>
    %34 = vector.extract_strided_slice %33 {offsets = [0, 0, 0], sizes = [2, 8, 32], strides = [1, 1, 1]} : vector<6x8x32xf32> to vector<2x8x32xf32>
    %35 = vector.shape_cast %34 : vector<2x8x32xf32> to vector<16x32xf32>
    %36 = vector.extract_strided_slice %33 {offsets = [1, 0, 0], sizes = [2, 8, 32], strides = [1, 1, 1]} : vector<6x8x32xf32> to vector<2x8x32xf32>
    %37 = vector.shape_cast %36 : vector<2x8x32xf32> to vector<16x32xf32>
    %38 = vector.extract_strided_slice %33 {offsets = [2, 0, 0], sizes = [2, 8, 32], strides = [1, 1, 1]} : vector<6x8x32xf32> to vector<2x8x32xf32>
    %39 = vector.shape_cast %38 : vector<2x8x32xf32> to vector<16x32xf32>
    %40 = vector.extract_strided_slice %33 {offsets = [3, 0, 0], sizes = [2, 8, 32], strides = [1, 1, 1]} : vector<6x8x32xf32> to vector<2x8x32xf32>
    %41 = vector.shape_cast %40 : vector<2x8x32xf32> to vector<16x32xf32>
    %42 = vector.extract_strided_slice %33 {offsets = [4, 0, 0], sizes = [2, 8, 32], strides = [1, 1, 1]} : vector<6x8x32xf32> to vector<2x8x32xf32>
    %43 = vector.shape_cast %42 : vector<2x8x32xf32> to vector<16x32xf32>
    %44 = tpu.concatenate %35, %37, %39, %41, %43 in 1 : vector<16x32xf32>, vector<16x32xf32>, vector<16x32xf32>, vector<16x32xf32>, vector<16x32xf32> -> vector<16x160xf32>
    %c128_10 = arith.constant 128 : index
    %c168 = arith.constant 168 : index
    %45 = vector.load %arg3[%c128_10, %c168] : memref<400x256xf32, #tpu.memory_space<vmem>>, vector<160x16xf32>
    %cst_11 = arith.constant dense<0.000000e+00> : vector<16x16xf32>
    %46 = tpu.matmul %44, %45, %cst_11 {dimension_numbers = #tpu.dot_dimension_numbers<[1], [0], [0], [1], [0, 0, 1, 1], [], []>} : vector<16x160xf32>, vector<160x16xf32>, vector<16x16xf32> -> vector<16x16xf32>
    %c397_12 = arith.constant 397 : index
    %c96 = arith.constant 96 : index
    %47 = vector.load %arg3[%c397_12, %c96] : memref<400x256xf32, #tpu.memory_space<vmem>>, vector<1x16xf32>
    %48 = vector.broadcast %47 : vector<1x16xf32> to vector<16x16xf32>
    %49 = arith.addf %46, %48 : vector<16x16xf32>
    %50 = vector.shape_cast %49 : vector<16x16xf32> to vector<2x8x16xf32>
    %51 = vector.extract_strided_slice %50 {offsets = [0, 0, 0], sizes = [1, 8, 16], strides = [1, 1, 1]} : vector<2x8x16xf32> to vector<1x8x16xf32>
    %52 = vector.shape_cast %51 : vector<1x8x16xf32> to vector<8x16xf32>
    %53 = vector.extract_strided_slice %50 {offsets = [1, 0, 0], sizes = [1, 8, 16], strides = [1, 1, 1]} : vector<2x8x16xf32> to vector<1x8x16xf32>
    %54 = vector.shape_cast %53 : vector<1x8x16xf32> to vector<8x16xf32>
    %55 = tpu.concatenate %52, %54 in 1 : vector<8x16xf32>, vector<8x16xf32> -> vector<8x32xf32>
    %c160 = arith.constant 160 : index
    %c192_13 = arith.constant 192 : index
    %56 = vector.load %arg3[%c160, %c192_13] : memref<400x256xf32, #tpu.memory_space<vmem>>, vector<32x32xf32>
    %cst_14 = arith.constant dense<0.000000e+00> : vector<8x32xf32>
    %57 = tpu.matmul %55, %56, %cst_14 {dimension_numbers = #tpu.dot_dimension_numbers<[1], [0], [0], [1], [0, 0, 1, 1], [], []>} : vector<8x32xf32>, vector<32x32xf32>, vector<8x32xf32> -> vector<8x32xf32>
    %c397_15 = arith.constant 397 : index
    %c112 = arith.constant 112 : index
    %58 = vector.load %arg3[%c397_15, %c112] : memref<400x256xf32, #tpu.memory_space<vmem>>, vector<1x32xf32>
    %59 = vector.broadcast %58 : vector<1x32xf32> to vector<8x32xf32>
    %60 = arith.addf %57, %59 : vector<8x32xf32>
    %61 = math.tanh %60 : vector<8x32xf32>
    %c200 = arith.constant 200 : index
    %c192_16 = arith.constant 192 : index
    %62 = vector.load %arg3[%c200, %c192_16] : memref<400x256xf32, #tpu.memory_space<vmem>>, vector<32x4xf32>
    %cst_17 = arith.constant dense<0.000000e+00> : vector<8x4xf32>
    %63 = tpu.matmul %61, %62, %cst_17 {dimension_numbers = #tpu.dot_dimension_numbers<[1], [0], [0], [1], [0, 0, 1, 1], [], []>} : vector<8x32xf32>, vector<32x4xf32>, vector<8x4xf32> -> vector<8x4xf32>
    %c397_18 = arith.constant 397 : index
    %c144 = arith.constant 144 : index
    %64 = vector.load %arg3[%c397_18, %c144] : memref<400x256xf32, #tpu.memory_space<vmem>>, vector<1x4xf32>
    %65 = vector.broadcast %64 : vector<1x4xf32> to vector<8x4xf32>
    %66 = arith.addf %63, %65 : vector<8x4xf32>
    %c0_19 = arith.constant 0 : index
    %c0_20 = arith.constant 0 : index
    %67 = vector.load %arg2[%c0_19, %c0_20] : memref<8x6xf32, #tpu.memory_space<vmem>>, vector<8x6xf32>
    %68 = tpu.concatenate %67, %66 in 1 : vector<8x6xf32>, vector<8x4xf32> -> vector<8x10xf32>
    %c384 = arith.constant 384 : index
    %c0_21 = arith.constant 0 : index
    %69 = vector.load %arg3[%c384, %c0_21] : memref<400x256xf32, #tpu.memory_space<vmem>>, vector<10x256xf32>
    %cst_22 = arith.constant dense<0.000000e+00> : vector<8x256xf32>
    %70 = tpu.matmul %68, %69, %cst_22 {dimension_numbers = #tpu.dot_dimension_numbers<[1], [0], [0], [1], [0, 0, 1, 1], [], []>} : vector<8x10xf32>, vector<10x256xf32>, vector<8x256xf32> -> vector<8x256xf32>
    %c394 = arith.constant 394 : index
    %c0_23 = arith.constant 0 : index
    %71 = vector.load %arg3[%c394, %c0_23] : memref<400x256xf32, #tpu.memory_space<vmem>>, vector<1x256xf32>
    %72 = vector.broadcast %71 : vector<1x256xf32> to vector<8x256xf32>
    %73 = arith.addf %70, %72 : vector<8x256xf32>
    %74 = math.tanh %73 : vector<8x256xf32>
    %c0_24 = arith.constant 0 : index
    %c0_25 = arith.constant 0 : index
    %75 = vector.load %arg3[%c0_24, %c0_25] : memref<400x256xf32, #tpu.memory_space<vmem>>, vector<256x128xf32>
    %cst_26 = arith.constant dense<0.000000e+00> : vector<8x128xf32>
    %76 = tpu.matmul %74, %75, %cst_26 {dimension_numbers = #tpu.dot_dimension_numbers<[1], [0], [0], [1], [0, 0, 1, 1], [], []>} : vector<8x256xf32>, vector<256x128xf32>, vector<8x128xf32> -> vector<8x128xf32>
    %c396 = arith.constant 396 : index
    %c0_27 = arith.constant 0 : index
    %77 = vector.load %arg3[%c396, %c0_27] : memref<400x256xf32, #tpu.memory_space<vmem>>, vector<1x128xf32>
    %78 = vector.broadcast %77 : vector<1x128xf32> to vector<8x128xf32>
    %79 = arith.addf %76, %78 : vector<8x128xf32>
    %80 = math.tanh %79 : vector<8x128xf32>
    %c256 = arith.constant 256 : index
    %c0_28 = arith.constant 0 : index
    %81 = vector.load %arg3[%c256, %c0_28] : memref<400x256xf32, #tpu.memory_space<vmem>>, vector<128x134xf32>
    %cst_29 = arith.constant dense<0.000000e+00> : vector<8x134xf32>
    %82 = tpu.matmul %80, %81, %cst_29 {dimension_numbers = #tpu.dot_dimension_numbers<[1], [0], [0], [1], [0, 0, 1, 1], [], []>} : vector<8x128xf32>, vector<128x134xf32>, vector<8x134xf32> -> vector<8x134xf32>
    %c395 = arith.constant 395 : index
    %c0_30 = arith.constant 0 : index
    %83 = vector.load %arg3[%c395, %c0_30] : memref<400x256xf32, #tpu.memory_space<vmem>>, vector<1x134xf32>
    %84 = vector.broadcast %83 : vector<1x134xf32> to vector<8x134xf32>
    %85 = arith.addf %82, %84 : vector<8x134xf32>
    %86 = vector.extract_strided_slice %85 {offsets = [0, 128], sizes = [8, 6], strides = [1, 1]} : vector<8x134xf32> to vector<8x6xf32>
    %87 = vector.extract_strided_slice %85 {offsets = [0, 0], sizes = [8, 128], strides = [1, 1]} : vector<8x134xf32> to vector<8x128xf32>
    %88 = math.tanh %87 : vector<8x128xf32>
    %c0_31 = arith.constant 0 : index
    %c128_32 = arith.constant 128 : index
    %89 = vector.load %arg3[%c0_31, %c128_32] : memref<400x256xf32, #tpu.memory_space<vmem>>, vector<128x128xf32>
    %cst_33 = arith.constant dense<0.000000e+00> : vector<8x128xf32>
    %90 = tpu.matmul %88, %89, %cst_33 {dimension_numbers = #tpu.dot_dimension_numbers<[1], [0], [0], [1], [0, 0, 1, 1], [], []>} : vector<8x128xf32>, vector<128x128xf32>, vector<8x128xf32> -> vector<8x128xf32>
    %c396_34 = arith.constant 396 : index
    %c128_35 = arith.constant 128 : index
    %91 = vector.load %arg3[%c396_34, %c128_35] : memref<400x256xf32, #tpu.memory_space<vmem>>, vector<1x128xf32>
    %92 = vector.broadcast %91 : vector<1x128xf32> to vector<8x128xf32>
    %93 = arith.addf %90, %92 : vector<8x128xf32>
    %94 = math.tanh %93 : vector<8x128xf32>
    %c128_36 = arith.constant 128 : index
    %c184 = arith.constant 184 : index
    %95 = vector.load %arg3[%c128_36, %c184] : memref<400x256xf32, #tpu.memory_space<vmem>>, vector<128x1xf32>
    %cst_37 = arith.constant dense<0.000000e+00> : vector<8x1xf32>
    %96 = tpu.matmul %94, %95, %cst_37 {dimension_numbers = #tpu.dot_dimension_numbers<[1], [0], [0], [1], [0, 0, 1, 1], [], []>} : vector<8x128xf32>, vector<128x1xf32>, vector<8x1xf32> -> vector<8x1xf32>
    %c397_38 = arith.constant 397 : index
    %c148 = arith.constant 148 : index
    %97 = vector.load %arg3[%c397_38, %c148] : memref<400x256xf32, #tpu.memory_space<vmem>>, vector<1x1xf32>
    %98 = vector.broadcast %97 : vector<1x1xf32> to vector<8x1xf32>
    %99 = arith.addf %96, %98 : vector<8x1xf32>
    %cst_39 = arith.constant 0.000000e+00 : f32
    %100 = vector.broadcast %cst_39 : f32 to vector<8x121xf32>
    %101 = tpu.concatenate %86, %99, %100 in 1 : vector<8x6xf32>, vector<8x1xf32>, vector<8x121xf32> -> vector<8x128xf32>
    %c0_40 = arith.constant 0 : index
    %c0_41 = arith.constant 0 : index
    %102 = vector.load %arg4[%c0_40, %c0_41] : memref<8x128xf32, #tpu.memory_space<vmem>>, vector<8x128xf32>
    tpu.vector_store %arg4[%c0_40, %c0_41], %101 {strides = array<i32>} : memref<8x128xf32, #tpu.memory_space<vmem>>, vector<8x128xf32>,
    return
  }
  func.func @transform_0(%arg0: i32) -> (i32, i32, i32) {
    %c0_i32 = arith.constant 0 : i32
    %c0_i32_0 = arith.constant 0 : i32
    %c0_i32_1 = arith.constant 0 : i32
    return %c0_i32, %arg0, %c0_i32_0 : i32, i32, i32
  }
  func.func @transform_1(%arg0: i32) -> (i32, i32) {
    %c0_i32 = arith.constant 0 : i32
    %c0_i32_0 = arith.constant 0 : i32
    return %arg0, %c0_i32 : i32, i32
  }
  func.func @transform_2(%arg0: i32) -> (i32, i32) {
    %c0_i32 = arith.constant 0 : i32
    %c0_i32_0 = arith.constant 0 : i32
    %c0_i32_1 = arith.constant 0 : i32
    return %c0_i32, %c0_i32_0 : i32, i32
  }
  func.func @transform_3(%arg0: i32) -> (i32, i32) {
    %c0_i32 = arith.constant 0 : i32
    %c0_i32_0 = arith.constant 0 : i32
    return %arg0, %c0_i32 : i32, i32
  }
}

</mosaic_0001>

<bundles_post_ra>
// kernel: cnn_estimator_forward.1
= control target key start
LH: loop header
LB: loop body
LE: loop exit
PB: predicated region body
PF: predicated region fallthrough
CT: control target
= control target key end

     0   :  { %vm35_vm0 = vcmask 48128   ;;  %s2531_s16 = smov 64   ;;  %vm84_vm1 = vcmask 1045504   ;;  %s2533_s4 = smov 120   ;;  %vm272_vm2 = vcmask 261120   ;;  %vm553_vm3 = vcmask 523264   ;;  %s3330_s2 = inlined_call_operand.vmem [shape: f32[400,256], index: 2, kind: input, shape index: {}]   ;;  %s3331_s0 = inlined_call_operand.vmem [shape: f32[16,8,6], index: 0, kind: input, shape index: {}]   ;;  %s3332_s1 = inlined_call_operand.vmem [shape: f32[8,6], index: 1, kind: input, shape index: {}]   ;;  %s3333_s3 = inlined_call_operand.vmem [shape: f32[8,128], index: 3, kind: output, shape index: {}]  }
   0x1   :  { %v30_v0 = vld [vmem:[%s3330_s2 + $0x188] sm:$0x3f]  ;;  %v14_v1 = vld [vmem:[%s3331_s0] sm:$0xff]  ;;  %v249_v3 = vld [vmem:[%s3330_s2 + $0x118] sm:$0xff]  ;;  %s2536_s12 = smov 88   ;;  %vm560_vm4 = vcmask 785408  }
   0x2   :  { %33 = vrot.lane.b32.xlu0 %v30_v0, %s2531_s16  ;;  %1902 = vmatprep.mubr.msk.f32.mxu0 %vm35_vm0, %v14_v1  ;;  %v248_v2 = vld [vmem:[%s3330_s2 + $0x108] sm:$0xff]  ;;  %v251_v6 = vld [vmem:[%s3330_s2 + $0x138] sm:$0xff]  ;;  %v16_v10 = vld [vmem:[%s3331_s0 + $0x10] sm:$0xff]  ;;  %vm2538_vm5 = vmmov 0   ;;  %vm953_vm6 = vcmask 130048   ;;  %vm1182_vm7 = vcmask 1041408  }
   0x3   :  { %v250_v4 = vld [vmem:[%s3330_s2 + $0x128] sm:$0xff]  ;;  %v2582_v5 = vpack.i.bf16 %v249_v3, %v248_v2  ;;  %v17_v11 = vld [vmem:[%s3331_s0 + $0x18] sm:$0xff]  ;;  %v18_v12 = vld [vmem:[%s3331_s0 + $0x20] sm:$0xff]  ;;  %vm2541_vm8 = vmmov 1   ;;  %s2542_s28 = smov 6   ;;  %vm1178_vm10 = vcmask 80896  }
   0x4   :  { %v2587_v7 = vpack.i.bf16 %v251_v6, %v250_v4  ;;  %v15_v9 = vld [vmem:[%s3331_s0 + $0x8] sm:$0xff]  ;;  %v20_v14 = vld [vmem:[%s3331_s0 + $0x30] sm:$0xff]  ;;  %v21_v15 = vld [vmem:[%s3331_s0 + $0x38] sm:$0xff]  ;;  %s2543_s5 = smov 72   ;;  %s2544_s21 = smov 108   ;;  %vm1729_vm11 = vcmask 56320  }
   0x5   :  { %v19_v13 = vld [vmem:[%s3331_s0 + $0x28] sm:$0xff]  ;;  %v22_v16 = vld [vmem:[%s3331_s0 + $0x40] sm:$0xff]  ;;  %v24_v18 = vld [vmem:[%s3331_s0 + $0x50] sm:$0xff] }
   0x6   :  { %2263 = vrot.lane.b32.xlu0 %v2582_v5, %s2531_s16  ;;  %2268 = vrot.lane.b32.xlu1 %v2587_v7, %s2531_s16  ;;  %v23_v17 = vld [vmem:[%s3331_s0 + $0x48] sm:$0xff]  ;;  %v25_v19 = vld [vmem:[%s3331_s0 + $0x58] sm:$0xff]  ;;  %vm2131_vm9 = vmpackc.low %vm1182_vm7, %vm2541_vm8 }
   0x7   :  { %v26_v20 = vld [vmem:[%s3331_s0 + $0x60] sm:$0xff]  ;;  %v27_v21 = vld [vmem:[%s3331_s0 + $0x68] sm:$0xff]  ;;  %v28_v22 = vld [vmem:[%s3331_s0 + $0x70] sm:$0xff] }
   0x8   :  { %v29_v23 = vld [vmem:[%s3331_s0 + $0x78] sm:$0xff]  ;;  %v2656_v32 = vld [vmem:[%s3330_s2 + $0x315] ss:$0 sm:$0xff]  ;;  %s2532_s0 = smov 96  }
   0xa   :  { %269 = vrot.lane.b32.xlu1 %v2656_v32, %s2532_s0  ;;  %2273 = vrot.lane.b32.xlu0 %v2582_v5, %s2533_s4 }
   0xe   :  { %2278 = vrot.lane.b32.xlu1 %v2587_v7, %s2533_s4 }
  0x74   :  { %v34_v8 = vpop.permute.xlu0 %33 }
  0x75   :  { %1900 = vmatprep.subr.msk.mxu0 %vm84_vm1, %v34_v8 }
  0x76   :  { %1901 = vmatpush3.msk.msra.mxu0 %vm84_vm1, %v34_v8 }
  0x77   :  { %1903 = vmatmul.mubr.msk.f32.vlgmr.msra.gmra.mrb[0].mxu0 %vm35_vm0, %v15_v9 }
  0x78   :  { %1905 = vmatprep.mubr.msk.f32.mxu0 %vm35_vm0, %v16_v10  ;;  %v2264_v24 = vpop.permute.xlu0 %2263  ;;  %v2269_v28 = vpop.permute.xlu1 %2268 }
  0x79   :  { %v2266_v25 = vunpack.i.h.bf16 %v2264_v24  ;;  %v2265_v26 = vunpack.i.l.bf16 %v2264_v24  ;;  %v2271_v29 = vunpack.i.h.bf16 %v2269_v28  ;;  %v2270_v30 = vunpack.i.l.bf16 %v2269_v28  ;;  %v575_v28 = vld [vmem:[%s3330_s2 + $0x188] sm:$0xff] }
  0x7b   :  { %1906 = vmatmul.mubr.msk.f32.gmra.mrb[2].mxu0 %vm35_vm0, %v17_v11  ;;  %v2050_v27 = vpack.c.bf16 %v2266_v25, %v2265_v26  ;;  %v2054_v31 = vpack.c.bf16 %v2271_v29, %v2270_v30  ;;  %v2719_v25 = vld [vmem:[%s3330_s2 + $0x1a8] sm:$0xff]  ;;  %v2724_v26 = vld [vmem:[%s3330_s2 + $0x1b8] sm:$0xff] }
  0x7c   :  { %1908 = vmatprep.mubr.msk.f32.mxu0 %vm35_vm0, %v18_v12  ;;  %v2738_v29 = vld [vmem:[%s3330_s2 + $0x198] sm:$0xff] }
  0x7d   :  { %2051 = vmatprep.subr.bf16.mxu1 %v2050_v27  ;;  %v2741_v30 = vpack.i.bf16 %v2738_v29, %v575_v28 }
  0x7e   :  { %2053 = vmatpush3.bf16.msra.mxu1 %v2050_v27  ;;  %v2728_v27 = vpack.i.bf16 %v2724_v26, %v2719_v25 }
  0x7f   :  { %1909 = vmatmul.mubr.msk.f32.gmra.mrb[4].mxu0 %vm35_vm0, %v19_v13  ;;  %2055 = vmatprep.subr.bf16.mxu1 %v2054_v31 }
  0x80   :  { %1911 = vmatprep.mubr.msk.f32.mxu0 %vm35_vm0, %v20_v14 }
  0x82   :  { %2057 = vmatpush3.bf16.msra.mxu1 %v2054_v31  ;;  %v581_v31 = vld [vmem:[%s3330_s2 + $0x1e8] sm:$0xff] }
  0x83   :  { %1912 = vmatmul.mubr.msk.f32.gmra.mrb[6].mxu0 %vm35_vm0, %v21_v15 }
  0x84   :  { %1914 = vmatprep.mubr.msk.f32.mxu0 %vm35_vm0, %v22_v16 }
  0x87   :  { %1915 = vmatmul.mubr.msk.f32.gmra.mrb[8].mxu0 %vm35_vm0, %v23_v17 }
  0x88   :  { %1917 = vmatprep.mubr.msk.f32.mxu0 %vm35_vm0, %v24_v18 }
  0x8b   :  { %1918 = vmatmul.mubr.msk.f32.gmra.mrb[10].mxu0 %vm35_vm0, %v25_v19  ;;  %v571_v19 = vld [vmem:[%s3330_s2 + $0x148] sm:$0xff] }
  0x8c   :  { %1920 = vmatprep.mubr.msk.f32.mxu0 %vm35_vm0, %v26_v20  ;;  %v572_v20 = vld [vmem:[%s3330_s2 + $0x158] sm:$0xff] }
  0x8f   :  { %1921 = vmatmul.mubr.msk.f32.gmra.mrb[12].mxu0 %vm35_vm0, %v27_v21  ;;  %v2702_v21 = vpack.i.bf16 %v572_v20, %v571_v19 }
  0x90   :  { %1923 = vmatprep.mubr.msk.f32.mxu0 %vm35_vm0, %v28_v22  ;;  %v573_v22 = vld [vmem:[%s3330_s2 + $0x168] sm:$0xff] }
  0x91   :  { %2283 = vrot.lane.b32.xlu0 %v2702_v21, %s2533_s4 }
  0x93   :  { %1924 = vmatmul.mubr.msk.f32.gmra.mrb[14].mxu0 %vm35_vm0, %v29_v23  ;;  %v574_v23 = vld [vmem:[%s3330_s2 + $0x178] sm:$0xff] }
  0x94   :  { %v2710_v24 = vpack.i.bf16 %v574_v23, %v573_v22 }
  0x95   :  { %2293 = vrot.lane.b32.xlu0 %v2741_v30, %s2533_s4 }
  0x96   :  { %2288 = vrot.lane.b32.xlu1 %v2710_v24, %s2533_s4 }
  0x9a   :  { %2298 = vrot.lane.b32.xlu1 %v2728_v27, %s2533_s4 }
 0x14a   :  { %v1904_v33 = vpop.f32.mrb[0].mxu0 }
 0x14b   :  { %v159_v34 = vadd.f32 %v1904_v33, %v2656_v32  ;;  %v153_v35 = vpop.f32.mrb[1].mxu0  ;;  %v582_v33 = vld [vmem:[%s3330_s2 + $0x1f8] sm:$0xff] }
 0x14c   :  { %v154_v36 = vadd.f32 %v153_v35, %v2656_v32  ;;  %v2758_v35 = vld [vmem:[%s3330_s2 + $0x228] sm:$0xff] }
 0x14e   :  { %2457 = vtanh.f32 %v154_v36  ;;  %v1907_v37 = vpop.f32.mrb[2].mxu0  ;;  %v2763_v36 = vld [vmem:[%s3330_s2 + $0x238] sm:$0xff] }
 0x14f   :  { %2459 = vtanh.f32 %v159_v34  ;;  %v169_v38 = vadd.f32 %v1907_v37, %v2656_v32  ;;  %v163_v39 = vpop.f32.mrb[3].mxu0  ;;  %v2749_v34 = vpack.i.bf16 %v582_v33, %v581_v31  ;;  %v2767_v37 = vpack.i.bf16 %v2763_v36, %v2758_v35 }
 0x150   :  { %v164_v40 = vadd.f32 %v163_v39, %v2656_v32  ;;  %v580_v39 = vld [vmem:[%s3330_s2 + $0x1d8] sm:$0xff] }
 0x151   :  { %2308 = vrot.lane.b32.xlu1 %v2749_v34, %s2533_s4 }
 0x152   :  { %2461 = vtanh.f32 %v164_v40  ;;  %v1910_v41 = vpop.f32.mrb[4].mxu0 }
 0x153   :  { %2463 = vtanh.f32 %v169_v38  ;;  %v179_v42 = vadd.f32 %v1910_v41, %v2656_v32  ;;  %v173_v43 = vpop.f32.mrb[5].mxu0  ;;  %v2774_v38 = vld [vmem:[%s3330_s2 + $0x1c8] sm:$0xff] }
 0x154   :  { %v174_v44 = vadd.f32 %v173_v43, %v2656_v32  ;;  %v2780_v40 = vpack.i.bf16 %v580_v39, %v2774_v38  ;;  %v2787_v41 = vld [vmem:[%s3330_s2 + $0x208] sm:$0xff] }
 0x155   :  { %2318 = vrot.lane.b32.xlu1 %v2767_v37, %s2533_s4 }
 0x156   :  { %2465 = vtanh.f32 %v174_v44  ;;  %v1913_v45 = vpop.f32.mrb[6].mxu0  ;;  %2303 = vrot.lane.b32.xlu0 %v2780_v40, %s2533_s4  ;;  %v2800_v44 = vpop.permute.xlu1 %269 }
 0x157   :  { %2467 = vtanh.f32 %v179_v42  ;;  %v189_v46 = vadd.f32 %v1913_v45, %v2656_v32  ;;  %v183_v47 = vpop.f32.mrb[7].mxu0  ;;  %v2792_v42 = vld [vmem:[%s3330_s2 + $0x218] sm:$0xff]  ;;  %v2274_v45 = vpop.permute.xlu0 %2273 }
 0x158   :  { %v2458_v48 = vpop.eup %2457  ;;  %v184_v49 = vadd.f32 %v183_v47, %v2656_v32  ;;  %v2796_v43 = vpack.i.bf16 %v2792_v42, %v2787_v41  ;;  %v2276_v47 = vunpack.i.h.bf16 %v2274_v45 }
 0x159   :  { %v2460_v50 = vpop.eup %2459  ;;  %1934 = vmatprep.mubr.msk.f32.mxu1 %vm272_vm2, %v2458_v48  ;;  %v2275_v48 = vunpack.i.l.bf16 %v2274_v45 }
 0x15a   :  { %2469 = vtanh.f32 %v184_v49  ;;  %v1916_v51 = vpop.f32.mrb[8].mxu0  ;;  %1935 = vmatmul.mubr.msk.f32.vlgmr.msra.gmra.mrb[0].mxu1 %vm272_vm2, %v2460_v50  ;;  %2313 = vrot.lane.b32.xlu0 %v2796_v43, %s2533_s4  ;;  %s2535_s4 = smov 32  }
 0x15b   :  { %2471 = vtanh.f32 %v189_v46  ;;  %v199_v52 = vadd.f32 %v1916_v51, %v2656_v32  ;;  %v193_v53 = vpop.f32.mrb[9].mxu0  ;;  %v2279_v46 = vpop.permute.xlu1 %2278  ;;  %v2534_v51 = vmov 0.0|0.0  }
 0x15c   :  { %v2462_v54 = vpop.eup %2461  ;;  %v194_v55 = vadd.f32 %v193_v53, %v2656_v32  ;;  %v2281_v49 = vunpack.i.h.bf16 %v2279_v46  ;;  %v2280_v50 = vunpack.i.l.bf16 %v2279_v46  ;;  %2058 = vmatprep.subr.bf16.mxu0 %v2534_v51  ;;  %2088 = vmatprep.subr.bf16.mxu1 %v2534_v51 }
 0x15d   :  { %v2464_v56 = vpop.eup %2463  ;;  %1937 = vmatprep.mubr.msk.f32.mxu1 %vm272_vm2, %v2462_v54  ;;  %v2284_v54 = vpop.permute.xlu0 %2283 }
 0x15e   :  { %2473 = vtanh.f32 %v194_v55  ;;  %v1919_v57 = vpop.f32.mrb[10].mxu0  ;;  %1938 = vmatmul.mubr.msk.f32.gmra.mrb[2].mxu1 %vm272_vm2, %v2464_v56  ;;  %v2062_v53 = vpack.c.bf16 %v2281_v49, %v2280_v50  ;;  %v2286_v55 = vunpack.i.h.bf16 %v2284_v54  ;;  %v2285_v56 = vunpack.i.l.bf16 %v2284_v54 }
 0x15f   :  { %2475 = vtanh.f32 %v199_v52  ;;  %v209_v58 = vadd.f32 %v1919_v57, %v2656_v32  ;;  %v203_v59 = vpop.f32.mrb[11].mxu0  ;;  %v2059_v52 = vpack.c.bf16 %v2276_v47, %v2275_v48  ;;  %v2289_v57 = vpop.permute.xlu1 %2288 }
 0x160   :  { %v2466_v60 = vpop.eup %2465  ;;  %v204_v61 = vadd.f32 %v203_v59, %v2656_v32  ;;  %v2290_v59 = vunpack.i.l.bf16 %v2289_v57 }
 0x161   :  { %v2468_v62 = vpop.eup %2467  ;;  %1940 = vmatprep.mubr.msk.f32.mxu1 %vm272_vm2, %v2466_v60  ;;  %2060 = vmatpush1.bf16.msra.mxu0 %v2059_v52  ;;  %v2065_v60 = vpack.c.bf16 %v2286_v55, %v2285_v56 }
 0x162   :  { %2477 = vtanh.f32 %v204_v61  ;;  %v1922_v63 = vpop.f32.mrb[12].mxu0  ;;  %1941 = vmatmul.mubr.msk.f32.gmra.mrb[4].mxu1 %vm272_vm2, %v2468_v62  ;;  %2061 = vmatprep.subr.bf16.mxu0 %v2534_v51 }
 0x163   :  { %2479 = vtanh.f32 %v209_v58  ;;  %v219_v0 = vadd.f32 %v1922_v63, %v2656_v32  ;;  %v213_v1 = vpop.f32.mrb[13].mxu0  ;;  %v2291_v58 = vunpack.i.h.bf16 %v2289_v57  ;;  %v2299_v62 = vpop.permute.xlu1 %2298 }
 0x164   :  { %v2470_v2 = vpop.eup %2469  ;;  %v214_v3 = vadd.f32 %v213_v1, %v2656_v32  ;;  %v2294_v63 = vpop.permute.xlu0 %2293  ;;  %v2300_v1 = vunpack.i.l.bf16 %v2299_v62 }
 0x165   :  { %v2472_v4 = vpop.eup %2471  ;;  %2481 = vtanh.f32 %v219_v0  ;;  %1943 = vmatprep.mubr.msk.f32.mxu1 %vm272_vm2, %v2470_v2  ;;  %2063 = vmatpush1.bf16.msra.mxu0 %v2062_v53  ;;  %v2068_v61 = vpack.c.bf16 %v2291_v58, %v2290_v59  ;;  %v2301_v0 = vunpack.i.h.bf16 %v2299_v62  ;;  %v2296_v2 = vunpack.i.h.bf16 %v2294_v63 }
 0x166   :  { %2483 = vtanh.f32 %v214_v3  ;;  %v1925_v6 = vpop.f32.mrb[14].mxu0  ;;  %1944 = vmatmul.mubr.msk.f32.gmra.mrb[6].mxu1 %vm272_vm2, %v2472_v4  ;;  %2064 = vmatprep.subr.bf16.mxu0 %v2534_v51  ;;  %v2295_v3 = vunpack.i.l.bf16 %v2294_v63 }
 0x167   :  { %v229_v8 = vadd.f32 %v1925_v6, %v2656_v32  ;;  %v223_v9 = vpop.f32.mrb[15].mxu0 }
 0x168   :  { %v2474_v10 = vpop.eup %2473  ;;  %v224_v11 = vadd.f32 %v223_v9, %v2656_v32 }
 0x169   :  { %v2476_v12 = vpop.eup %2475  ;;  %2485 = vtanh.f32 %v229_v8  ;;  %1946 = vmatprep.mubr.msk.f32.mxu1 %vm272_vm2, %v2474_v10  ;;  %2066 = vmatpush1.bf16.msra.mxu0 %v2065_v60  ;;  %v2071_v8 = vpack.c.bf16 %v2296_v2, %v2295_v3  ;;  %v2074_v10 = vpack.c.bf16 %v2301_v0, %v2300_v1 }
 0x16a   :  { %2487 = vtanh.f32 %v224_v11  ;;  %1947 = vmatmul.mubr.msk.f32.gmra.mrb[8].mxu1 %vm272_vm2, %v2476_v12  ;;  %2067 = vmatprep.subr.bf16.mxu0 %v2534_v51 }
 0x16c   :  { %v2478_v13 = vpop.eup %2477 }
 0x16d   :  { %v2480_v14 = vpop.eup %2479  ;;  %1949 = vmatprep.mubr.msk.f32.mxu1 %vm272_vm2, %v2478_v13  ;;  %2069 = vmatpush1.bf16.msra.mxu0 %v2068_v61 }
 0x16e   :  { %1950 = vmatmul.mubr.msk.f32.gmra.mrb[10].mxu1 %vm272_vm2, %v2480_v14  ;;  %2070 = vmatprep.subr.bf16.mxu0 %v2534_v51 }
 0x16f   :  { %v2482_v15 = vpop.eup %2481 }
 0x170   :  { %v2484_v16 = vpop.eup %2483 }
 0x171   :  { %1952 = vmatprep.mubr.msk.f32.mxu1 %vm272_vm2, %v2484_v16  ;;  %2072 = vmatpush1.bf16.msra.mxu0 %v2071_v8 }
 0x172   :  { %1953 = vmatmul.mubr.msk.f32.gmra.mrb[12].mxu1 %vm272_vm2, %v2482_v15  ;;  %2073 = vmatprep.subr.bf16.mxu0 %v2534_v51 }
 0x173   :  { %v2486_v17 = vpop.eup %2485 }
 0x174   :  { %v2488_v18 = vpop.eup %2487 }
 0x175   :  { %1955 = vmatprep.mubr.msk.f32.mxu1 %vm272_vm2, %v2488_v18  ;;  %2075 = vmatpush1.bf16.msra.mxu0 %v2074_v10 }
 0x176   :  { %1956 = vmatmul.mubr.msk.f32.gmra.mrb[14].mxu1 %vm272_vm2, %v2486_v17  ;;  %2076 = vmatprep.subr.bf16.mxu0 %v2534_v51 }
 0x1c3   :  { %v2309_v13 = vpop.permute.xlu1 %2308 }
 0x1c4   :  { %v2311_v15 = vunpack.i.h.bf16 %v2309_v13  ;;  %v2310_v17 = vunpack.i.l.bf16 %v2309_v13 }
 0x1c6   :  { %v2080_v28 = vpack.c.bf16 %v2311_v15, %v2310_v17 }
 0x1c7   :  { %v2319_v39 = vpop.permute.xlu1 %2318 }
 0x1c8   :  { %v2304_v16 = vpop.permute.xlu0 %2303  ;;  %v2321_v46 = vunpack.i.h.bf16 %v2319_v39  ;;  %v2320_v47 = vunpack.i.l.bf16 %v2319_v39 }
 0x1c9   :  { %v2306_v18 = vunpack.i.h.bf16 %v2304_v16  ;;  %v2305_v19 = vunpack.i.l.bf16 %v2304_v16 }
 0x1ca   :  { %v2086_v59 = vpack.c.bf16 %v2321_v46, %v2320_v47 }
 0x1cb   :  { %v2077_v23 = vpack.c.bf16 %v2306_v18, %v2305_v19 }
 0x1cc   :  { %v2314_v45 = vpop.permute.xlu0 %2313 }
 0x1cd   :  { %2078 = vmatpush1.bf16.msra.mxu0 %v2077_v23  ;;  %v2316_v48 = vunpack.i.h.bf16 %v2314_v45  ;;  %v2315_v49 = vunpack.i.l.bf16 %v2314_v45 }
 0x1ce   :  { %2079 = vmatprep.subr.bf16.mxu0 %v2534_v51 }
 0x1cf   :  { %v2083_v55 = vpack.c.bf16 %v2316_v48, %v2315_v49 }
 0x1d1   :  { %2081 = vmatpush1.bf16.msra.mxu0 %v2080_v28 }
 0x1d2   :  { %2082 = vmatprep.subr.bf16.mxu0 %v2534_v51 }
 0x1d5   :  { %2084 = vmatpush1.bf16.msra.mxu0 %v2083_v55 }
 0x1d6   :  { %2085 = vmatprep.subr.bf16.mxu0 %v2534_v51 }
 0x1d9   :  { %2087 = vmatpush1.bf16.msra.mxu0 %v2086_v59 }
 0x22d   :  { %v1936_v4 = vpop.f32.mrb[0].mxu1 }
 0x22e   :  { %v2808_v6 = vpop.f32.mrb[1].mxu1  ;;  %v393_v9 = vadd.f32 %v1936_v4, %v2800_v44 }
 0x230   :  { %2489 = vtanh.f32 %v393_v9 }
 0x231   :  { %v1939_v11 = vpop.f32.mrb[2].mxu1 }
 0x232   :  { %v397_v12 = vpop.f32.mrb[3].mxu1  ;;  %v403_v1 = vadd.f32 %v1939_v11, %v2800_v44 }
 0x233   :  { %v398_v14 = vadd.f32 %v397_v12, %v2800_v44 }
 0x235   :  { %2491 = vtanh.f32 %v398_v14  ;;  %v1942_v20 = vpop.f32.mrb[4].mxu1 }
 0x236   :  { %v407_v22 = vpop.f32.mrb[5].mxu1  ;;  %v413_v15 = vadd.f32 %v1942_v20, %v2800_v44 }
 0x237   :  { %v408_v63 = vadd.f32 %v407_v22, %v2800_v44 }
 0x239   :  { %v2814_v31 = vpop.f32.mrb[6].mxu1 }
 0x23a   :  { %v417_v33 = vpop.f32.mrb[7].mxu1  ;;  %v2818_v52 = vpop.eup %2489 }
 0x23b   :  { %v418_v20 = vadd.f32 %v417_v33, %v2800_v44 }
 0x23d   :  { %v1948_v50 = vpop.f32.mrb[8].mxu1 }
 0x23e   :  { %v433_v53 = vadd.f32 %v1948_v50, %v2800_v44  ;;  %v427_v54 = vpop.f32.mrb[9].mxu1 }
 0x23f   :  { %v2821_v56 = vpop.eup %2491  ;;  %v428_v57 = vadd.f32 %v427_v54, %v2800_v44 }
 0x240   :  { %2493 = vtanh.f32 %v433_v53  ;;  %1769 = vmatprep.mubr.msk.f32.mxu0 %vm272_vm2, %v2821_v56  ;;  %v2322_v58 = vpack.i.bf16 %v2821_v56, %v2818_v52 }
 0x241   :  { %2495 = vtanh.f32 %v428_v57  ;;  %v1951_v60 = vpop.f32.mrb[10].mxu1 }
 0x242   :  { %v443_v61 = vadd.f32 %v1951_v60, %v2800_v44  ;;  %v437_v62 = vpop.f32.mrb[11].mxu1  ;;  %2323 = vrot.lane.b32.xlu1 %v2322_v58, %s2531_s16 }
 0x243   :  { %v438_v0 = vadd.f32 %v437_v62, %v2800_v44  ;;  %v423_v62 = vadd.f32 %v2814_v31, %v2800_v44 }
 0x244   :  { %2497 = vtanh.f32 %v443_v61 }
 0x245   :  { %2499 = vtanh.f32 %v438_v0  ;;  %v1954_v2 = vpop.f32.mrb[12].mxu1 }
 0x246   :  { %v447_v3 = vpop.f32.mrb[13].mxu1  ;;  %2501 = vtanh.f32 %v408_v63  ;;  %v453_v11 = vadd.f32 %v1954_v2, %v2800_v44 }
 0x247   :  { %2503 = vtanh.f32 %v403_v1  ;;  %v448_v12 = vadd.f32 %v447_v3, %v2800_v44 }
 0x249   :  { %v1957_v4 = vpop.f32.mrb[14].mxu1  ;;  %2505 = vtanh.f32 %v448_v12 }
 0x24a   :  { %v2494_v8 = vpop.eup %2493  ;;  %v457_v9 = vpop.f32.mrb[15].mxu1  ;;  %2507 = vtanh.f32 %v413_v15 }
 0x24b   :  { %v2496_v10 = vpop.eup %2495  ;;  %2509 = vtanh.f32 %v453_v11  ;;  %v458_v28 = vadd.f32 %v457_v9, %v2800_v44 }
 0x24c   :  { %v2327_v13 = vpack.i.bf16 %v2494_v8, %v2496_v10  ;;  %2511 = vtanh.f32 %v418_v20 }
 0x24d   :  { %2513 = vtanh.f32 %v458_v28 }
 0x24e   :  { %v2498_v14 = vpop.eup %2497  ;;  %2328 = vrot.lane.b32.xlu0 %v2327_v13, %s2535_s4 }
 0x24f   :  { %v2500_v16 = vpop.eup %2499 }
 0x250   :  { %v2332_v17 = vpack.i.bf16 %v2500_v16, %v2494_v8  ;;  %v2342_v18 = vpack.i.bf16 %v2498_v14, %v2500_v16  ;;  %v2838_v19 = vpop.eup %2501 }
 0x251   :  { %v2842_v22 = vpop.eup %2503 }
 0x252   :  { %2333 = vrot.lane.b32.xlu0 %v2332_v17, %s2532_s0  ;;  %2343 = vrot.lane.b32.xlu1 %v2342_v18, %s2535_s4  ;;  %v2337_v23 = vpack.i.bf16 %v2838_v19, %v2842_v22 }
 0x253   :  { %v2506_v39 = vpop.eup %2505 }
 0x254   :  { %v2852_v45 = vpop.eup %2507 }
 0x255   :  { %v2510_v33 = vpop.eup %2509 }
 0x256   :  { %2338 = vrot.lane.b32.xlu0 %v2337_v23, %s2531_s16  ;;  %533 = vrot.lane.b32.xlu1 %v2498_v14, %s2532_s0  ;;  %v2857_v46 = vpop.eup %2511 }
 0x257   :  { %v2514_v47 = vpop.eup %2513 }
 0x25a   :  { %535 = vrot.lane.b32.xlu0 %v2506_v39, %s2532_s0  ;;  %494 = vrot.lane.b32.xlu1 %v2506_v39, %s2535_s4 }
 0x25e   :  { %518 = vrot.lane.b32.xlu0 %v2852_v45, %s2531_s16  ;;  %537 = vrot.lane.b32.xlu1 %v2510_v33, %s2532_s0 }
 0x262   :  { %496 = vrot.lane.b32.xlu0 %v2510_v33, %s2535_s4  ;;  %520 = vrot.lane.b32.xlu1 %v2857_v46, %s2531_s16 }
 0x266   :  { %539 = vrot.lane.b32.xlu0 %v2514_v47, %s2532_s0  ;;  %667 = vrot.lane.b32.xlu1 %v2656_v32, %s2531_s16 }
 0x26a   :  { %2348 = vrot.lane.b32.xlu0 %v2582_v5, %s2536_s12  ;;  %2353 = vrot.lane.b32.xlu1 %v2587_v7, %s2536_s12  ;;  %v388_v5 = vadd.f32 %v2808_v6, %v2800_v44 }
 0x26c   :  { %2515 = vtanh.f32 %v388_v5 }
 0x26d   :  { %2517 = vtanh.f32 %v423_v62 }
 0x26e   :  { %2358 = vrot.lane.b32.xlu0 %v2702_v21, %s2536_s12  ;;  %2363 = vrot.lane.b32.xlu1 %v2710_v24, %s2536_s12 }
 0x272   :  { %2368 = vrot.lane.b32.xlu0 %v2741_v30, %s2536_s12  ;;  %2373 = vrot.lane.b32.xlu1 %v2728_v27, %s2536_s12 }
 0x276   :  { %2378 = vrot.lane.b32.xlu0 %v2780_v40, %s2536_s12  ;;  %2383 = vrot.lane.b32.xlu1 %v2749_v34, %s2536_s12  ;;  %v2516_v50 = vpop.eup %2515 }
 0x277   :  { %v2518_v18 = vpop.eup %2517 }
 0x27a   :  { %2388 = vrot.lane.b32.xlu0 %v2796_v43, %s2536_s12  ;;  %2393 = vrot.lane.b32.xlu1 %v2767_v37, %s2536_s12 }
 0x2b4   :  { %v2324_v7 = vpop.permute.xlu1 %2323 }
 0x2b5   :  { %v2325_v27 = vunpack.i.l.bf16 %v2324_v7  ;;  %v2326_v58 = vunpack.i.h.bf16 %v2324_v7 }
 0x2c0   :  { %v2329_v48 = vpop.permute.xlu0 %2328 }
 0x2c1   :  { %v2330_v49 = vunpack.i.l.bf16 %v2329_v48  ;;  %v2331_v53 = vunpack.i.h.bf16 %v2329_v48 }
 0x2c3   :  { %v547_v30 = vsel %vm272_vm2, %v2516_v50, %v2330_v49  ;;  %v548_v57 = vsel %vm272_vm2, %v2818_v52, %v2331_v53 }
 0x2c4   :  { %v2334_v40 = vpop.permute.xlu0 %2333  ;;  %v2344_v54 = vpop.permute.xlu1 %2343  ;;  %v554_v43 = vsel %vm553_vm3, %v547_v30, %v2325_v27  ;;  %v555_v63 = vsel %vm553_vm3, %v548_v57, %v2326_v58 }
 0x2c5   :  { %v2335_v34 = vunpack.i.l.bf16 %v2334_v40  ;;  %v2336_v37 = vunpack.i.h.bf16 %v2334_v40  ;;  %v2345_v55 = vunpack.i.l.bf16 %v2344_v54  ;;  %v2346_v0 = vunpack.i.h.bf16 %v2344_v54 }
 0x2c7   :  { %v561_v6 = vsel %vm560_vm4, %v554_v43, %v2335_v34  ;;  %v562_v1 = vsel %vm560_vm4, %v555_v63, %v2336_v37  ;;  %v549_v2 = vsel %vm272_vm2, %v2821_v56, %v2345_v55  ;;  %v550_v31 = vsel %vm272_vm2, %v2842_v22, %v2346_v0 }
 0x2c8   :  { %v2339_v59 = vpop.permute.xlu0 %2338  ;;  %v534_v60 = vpop.permute.xlu1 %533  ;;  %748 = vmatmul.mubr.f32.vlgmr.msra.gmra.mrb[16].mxu0 %v561_v6 }
 0x2c9   :  { %v2340_v61 = vunpack.i.l.bf16 %v2339_v59  ;;  %1770 = vmatprep.mubr.msk.f32.mxu0 %vm272_vm2, %v2842_v22  ;;  %v2341_v52 = vunpack.i.h.bf16 %v2339_v59 }
 0x2cb   :  { %v556_v8 = vsel %vm553_vm3, %v549_v2, %v2340_v61  ;;  %v557_v10 = vsel %vm553_vm3, %v550_v31, %v2341_v52 }
 0x2cc   :  { %v536_v3 = vpop.permute.xlu0 %535  ;;  %v495_v4 = vpop.permute.xlu1 %494  ;;  %753 = vmatmul.mubr.f32.gmra.mrb[18].mxu0 %v562_v1  ;;  %v563_v44 = vsel %vm560_vm4, %v556_v8, %v534_v60 }
 0x2cd   :  { %1771 = vmatprep.mubr.msk.f32.mxu0 %vm272_vm2, %v2838_v19  ;;  %v551_v12 = vsel %vm272_vm2, %v2838_v19, %v495_v4  ;;  %v564_v13 = vsel %vm560_vm4, %v557_v10, %v536_v3 }
 0x2d0   :  { %v519_v9 = vpop.permute.xlu0 %518  ;;  %758 = vmatmul.mubr.f32.gmra.mrb[20].mxu0 %v563_v44  ;;  %v538_v56 = vpop.permute.xlu1 %537 }
 0x2d1   :  { %1772 = vmatprep.mubr.msk.f32.mxu0 %vm272_vm2, %v2852_v45  ;;  %v558_v14 = vsel %vm553_vm3, %v551_v12, %v519_v9 }
 0x2d2   :  { %v565_v17 = vsel %vm560_vm4, %v558_v14, %v538_v56 }
 0x2d4   :  { %v497_v15 = vpop.permute.xlu0 %496  ;;  %763 = vmatmul.mubr.f32.gmra.mrb[22].mxu0 %v564_v13  ;;  %v521_v11 = vpop.permute.xlu1 %520 }
 0x2d5   :  { %1773 = vmatprep.mubr.msk.f32.mxu0 %vm272_vm2, %v2857_v46  ;;  %v552_v16 = vsel %vm272_vm2, %v2852_v45, %v497_v15 }
 0x2d6   :  { %v559_v19 = vsel %vm553_vm3, %v552_v16, %v521_v11 }
 0x2d8   :  { %v540_v22 = vpop.permute.xlu0 %539  ;;  %768 = vmatmul.mubr.f32.gmra.mrb[24].mxu0 %v565_v17  ;;  %v2911_v23 = vpop.permute.xlu1 %667 }
 0x2d9   :  { %1774 = vmatprep.mubr.msk.f32.mxu0 %vm272_vm2, %v2518_v18  ;;  %v566_v20 = vsel %vm560_vm4, %v559_v19, %v540_v22 }
 0x2dc   :  { %773 = vmatmul.mubr.f32.gmra.mrb[26].mxu0 %v566_v20  ;;  %v2349_v28 = vpop.permute.xlu0 %2348  ;;  %v2354_v39 = vpop.permute.xlu1 %2353 }
 0x2dd   :  { %v2351_v33 = vunpack.i.h.bf16 %v2349_v28  ;;  %v2350_v46 = vunpack.i.l.bf16 %v2349_v28  ;;  %v2356_v45 = vunpack.i.h.bf16 %v2354_v39  ;;  %v2355_v47 = vunpack.i.l.bf16 %v2354_v39 }
 0x2df   :  { %v2089_v5 = vpack.c.bf16 %v2351_v33, %v2350_v46  ;;  %v2092_v48 = vpack.c.bf16 %v2356_v45, %v2355_v47 }
 0x2e0   :  { %v2359_v7 = vpop.permute.xlu0 %2358  ;;  %v2364_v53 = vpop.permute.xlu1 %2363 }
 0x2e1   :  { %2090 = vmatpush1.bf16.msra.mxu1 %v2089_v5  ;;  %v2361_v49 = vunpack.i.h.bf16 %v2359_v7  ;;  %v2360_v50 = vunpack.i.l.bf16 %v2359_v7  ;;  %v2366_v27 = vunpack.i.h.bf16 %v2364_v53  ;;  %v2365_v40 = vunpack.i.l.bf16 %v2364_v53 }
 0x2e2   :  { %2091 = vmatprep.subr.bf16.mxu1 %v2534_v51 }
 0x2e3   :  { %v2095_v30 = vpack.c.bf16 %v2361_v49, %v2360_v50  ;;  %v2098_v34 = vpack.c.bf16 %v2366_v27, %v2365_v40 }
 0x2e4   :  { %v2369_v54 = vpop.permute.xlu0 %2368  ;;  %v2374_v55 = vpop.permute.xlu1 %2373 }
 0x2e5   :  { %2093 = vmatpush1.bf16.msra.mxu1 %v2092_v48  ;;  %v2371_v43 = vunpack.i.h.bf16 %v2369_v54  ;;  %v2370_v37 = vunpack.i.l.bf16 %v2369_v54  ;;  %v2376_v57 = vunpack.i.h.bf16 %v2374_v55  ;;  %v2375_v58 = vunpack.i.l.bf16 %v2374_v55 }
 0x2e6   :  { %2094 = vmatprep.subr.bf16.mxu1 %v2534_v51 }
 0x2e7   :  { %v2101_v6 = vpack.c.bf16 %v2371_v43, %v2370_v37  ;;  %v2104_v60 = vpack.c.bf16 %v2376_v57, %v2375_v58 }
 0x2e8   :  { %v2379_v59 = vpop.permute.xlu0 %2378  ;;  %v2384_v63 = vpop.permute.xlu1 %2383 }
 0x2e9   :  { %2096 = vmatpush1.bf16.msra.mxu1 %v2095_v30  ;;  %v2381_v61 = vunpack.i.h.bf16 %v2379_v59  ;;  %v2380_v62 = vunpack.i.l.bf16 %v2379_v59  ;;  %v2386_v1 = vunpack.i.h.bf16 %v2384_v63  ;;  %v2385_v2 = vunpack.i.l.bf16 %v2384_v63 }
 0x2ea   :  { %2097 = vmatprep.subr.bf16.mxu1 %v2534_v51 }
 0x2eb   :  { %v2107_v0 = vpack.c.bf16 %v2381_v61, %v2380_v62  ;;  %v2110_v3 = vpack.c.bf16 %v2386_v1, %v2385_v2  ;;  %v2539_v61 = vmov 0.0  }
 0x2ec   :  { %v2389_v52 = vpop.permute.xlu0 %2388  ;;  %v2394_v44 = vpop.permute.xlu1 %2393  ;;  %1253 = vmatprep.mubr.f32.mxu0 %v2539_v61 }
 0x2ed   :  { %2099 = vmatpush1.bf16.msra.mxu1 %v2098_v34  ;;  %v2391_v4 = vunpack.i.h.bf16 %v2389_v52  ;;  %v2390_v8 = vunpack.i.l.bf16 %v2389_v52  ;;  %v2396_v9 = vunpack.i.h.bf16 %v2394_v44  ;;  %v2395_v10 = vunpack.i.l.bf16 %v2394_v44  ;;  %v2961_v52 = vld [vmem:[%s3330_s2 + $0x31d] ss:$0 sm:$0xff] }
 0x2ee   :  { %2100 = vmatprep.subr.bf16.mxu1 %v2534_v51 }
 0x2ef   :  { %v2113_v31 = vpack.c.bf16 %v2391_v4, %v2390_v8  ;;  %v2116_v56 = vpack.c.bf16 %v2396_v9, %v2395_v10 }
 0x2f1   :  { %2102 = vmatpush1.bf16.msra.mxu1 %v2101_v6 }
 0x2f2   :  { %2103 = vmatprep.subr.bf16.mxu1 %v2534_v51 }
 0x2f5   :  { %2105 = vmatpush1.bf16.msra.mxu1 %v2104_v60 }
 0x2f6   :  { %2106 = vmatprep.subr.bf16.mxu1 %v2534_v51 }
 0x2f9   :  { %2108 = vmatpush1.bf16.msra.mxu1 %v2107_v0 }
 0x2fa   :  { %2109 = vmatprep.subr.bf16.mxu1 %v2534_v51 }
 0x2fd   :  { %2111 = vmatpush1.bf16.msra.mxu1 %v2110_v3  ;;  %v2412_v3 = vpack.i.bf16 %v2774_v38, %v2724_v26 }
 0x2fe   :  { %2112 = vmatprep.subr.bf16.mxu1 %v2534_v51 }
 0x301   :  { %2114 = vmatpush1.bf16.msra.mxu1 %v2113_v31 }
 0x302   :  { %2115 = vmatprep.subr.bf16.mxu1 %v2534_v51 }
 0x305   :  { %2117 = vmatpush1.bf16.msra.mxu1 %v2116_v56 }
 0x306   :  { %2118 = vmatprep.subr.bf16.mxu1 %v2534_v51 }
 0x39b   :  { %v749_v12 = vpop.f32.mrb[16].mxu0 }
 0x39c   :  { %v751_v13 = vpop.f32.mrb[17].mxu0  ;;  %v750_v7 = vadd.f32 %v749_v12, %v2911_v23 }
 0x39f   :  { %v754_v14 = vpop.f32.mrb[18].mxu0 }
 0x3a0   :  { %v755_v15 = vadd.f32 %v754_v14, %v2911_v23  ;;  %v756_v16 = vpop.f32.mrb[19].mxu0 }
 0x3a2   :  { %780 = vrot.lane.b32.xlu0 %v755_v15, %s2535_s4 }
 0x3a3   :  { %v759_v11 = vpop.f32.mrb[20].mxu0 }
 0x3a4   :  { %v760_v17 = vadd.f32 %v759_v11, %v2911_v23  ;;  %v761_v18 = vpop.f32.mrb[21].mxu0 }
 0x3a5   :  { %v1162_v18 = vld [vmem:[%s3330_s2 + $0x308] sm:$0xff] }
 0x3a6   :  { %787 = vrot.lane.b32.xlu1 %v760_v17, %s2531_s16 }
 0x3a7   :  { %v764_v22 = vpop.f32.mrb[22].mxu0 }
 0x3a8   :  { %v765_v19 = vadd.f32 %v764_v22, %v2911_v23  ;;  %v766_v20 = vpop.f32.mrb[23].mxu0  ;;  %v1164_v22 = vld [vmem:[%s3330_s2 + $0x318] sm:$0x3] }
 0x3a9   :  { %v2130_v20 = vpack.c.bf16 %v1164_v22, %v1162_v18  ;;  %v1276_v22 = vld [vmem:[%s3330_s2 + $0xe0] sm:$0xff] }
 0x3aa   :  { %782 = vrot.lane.b32.xlu1 %v760_v17, %s2535_s4  ;;  %794 = vrot.lane.b32.xlu0 %v765_v19, %s2532_s0 }
 0x3ab   :  { %v769_v28 = vpop.f32.mrb[24].mxu0  ;;  %2132 = vmatprep.subr.msk.bf16.mxu0 %vm2131_vm9, %v2130_v20 }
 0x3ac   :  { %v770_v39 = vadd.f32 %v769_v28, %v2911_v23  ;;  %v771_v33 = vpop.f32.mrb[25].mxu0  ;;  %v1163_v28 = vld [vmem:[%s3330_s2 + $0x310] sm:$0x3] }
 0x3ad   :  { %v1278_v33 = vld [vmem:[%s3330_s2 + $0x100] sm:$0xff] }
 0x3ae   :  { %1775 = vmatprep.mubr.msk.f32.mxu1 %vm272_vm2, %v770_v39  ;;  %796 = vrot.lane.b32.xlu1 %v770_v39, %s2532_s0  ;;  %s2537_s0 = smov 16  }
 0x3af   :  { %789 = vrot.lane.b32.xlu0 %v765_v19, %s2531_s16  ;;  %v774_v46 = vpop.f32.mrb[26].mxu0  ;;  %v1161_v19 = vld [vmem:[%s3330_s2 + $0x300] sm:$0xff] }
 0x3b0   :  { %v776_v45 = vpop.f32.mrb[27].mxu0  ;;  %v775_v30 = vadd.f32 %v774_v46, %v2911_v23  ;;  %v2133_v39 = vpack.c.bf16 %v1163_v28, %v1161_v19  ;;  %v1279_v46 = vld [vmem:[%s3330_s2 + $0x110] sm:$0xff]  ;;  %v2168_v28 = vpack.c.bf16 %v2792_v42, %v2787_v41  ;;  %v1375_v42 = vld [vmem:[%s3330_s2 + $0x248] sm:$0xff] }
 0x3b1   :  { %v1262_v45 = vld [vmem:[%s3330_s2] sm:$0xff]  ;;  %v1277_v19 = vld [vmem:[%s3330_s2 + $0xf0] sm:$0xff] }
 0x3b2   :  { %2398 = vrot.lane.b32.xlu1 %v2702_v21, %s2531_s16  ;;  %2135 = vmatpush1.bf16.msk.msra.mxu0 %vm2131_vm9, %v2133_v39  ;;  %v2166_v20 = vpack.c.bf16 %v1277_v19, %v1276_v22  ;;  %v1366_v39 = vld [vmem:[%s3330_s2 + $0x200] sm:$0xff]  ;;  %v1372_v41 = vld [vmem:[%s3330_s2 + $0x230] sm:$0xff]  ;;  %v1484_v22 = vld [vmem:[%s3330_s2 + $0x18] sm:$0xff] }
 0x3b3   :  { %866 = vrot.lane.b32.xlu0 %v2656_v32, %s2535_s4  ;;  %2169 = vmatprep.subr.bf16.mxu0 %v2168_v28  ;;  %v1485_v19 = vld [vmem:[%s3330_s2 + $0x28] sm:$0xff]  ;;  %v1486_v28 = vld [vmem:[%s3330_s2 + $0x38] sm:$0xff] }
 0x3b7   :  { %2403 = vrot.lane.b32.xlu0 %v2710_v24, %s2531_s16 }
 0x3bb   :  { %979 = vrot.lane.b32.xlu0 %v2656_v32, %s2537_s0  ;;  %v2407_v32 = vpack.i.bf16 %v2719_v25, %v2738_v29 }
 0x3bf   :  { %2408 = vrot.lane.b32.xlu0 %v2407_v32, %s2531_s16 }
 0x414   :  { %v781_v47 = vpop.permute.xlu0 %780 }
 0x415   :  { %v800_v48 = vsel %vm272_vm2, %v750_v7, %v781_v47  ;;  %v2136_v47 = vpack.c.bf16 %v1279_v46, %v1278_v33  ;;  %v1280_v7 = vld [vmem:[%s3330_s2 + $0x120] sm:$0xff]  ;;  %v1368_v33 = vld [vmem:[%s3330_s2 + $0x210] sm:$0xff]  ;;  %v2172_v46 = vpack.c.bf16 %v2763_v36, %v2758_v35 }
 0x418   :  { %v788_v5 = vpop.permute.xlu1 %787 }
 0x419   :  { %v802_v49 = vsel %vm553_vm3, %v800_v48, %v788_v5  ;;  %v1263_v5 = vld [vmem:[%s3330_s2 + $0x10] sm:$0xff] }
 0x41a   :  { %v1281_v48 = vld [vmem:[%s3330_s2 + $0x130] sm:$0xff] }
 0x41c   :  { %v783_v50 = vpop.permute.xlu1 %782  ;;  %v795_v53 = vpop.permute.xlu0 %794 }
 0x41d   :  { %v804_v21 = vsel %vm560_vm4, %v802_v49, %v795_v53  ;;  %v801_v24 = vsel %vm272_vm2, %v755_v15, %v783_v50  ;;  %v2138_v49 = vpack.c.bf16 %v1263_v5, %v1262_v45  ;;  %v2140_v50 = vpack.c.bf16 %v1281_v48, %v1280_v7  ;;  %v1264_v53 = vld [vmem:[%s3330_s2 + $0x20] sm:$0xff]  ;;  %v1377_v5 = vld [vmem:[%s3330_s2 + $0x258] sm:$0xff]  ;;  %v1376_v48 = vld [vmem:[%s3330_s2 + $0x250] sm:$0xff] }
 0x41e   :  { %939 = vmatmul.mubr.f32.vlgmr.msra.gmra.mrb[16].mxu1 %v804_v21  ;;  %v1282_v21 = vld [vmem:[%s3330_s2 + $0x140] sm:$0xff]  ;;  %v2176_v36 = vpack.c.bf16 %v1377_v5, %v1375_v42  ;;  %v1491_v5 = vld [vmem:[%s3330_s2 + $0x88] sm:$0xff] }
 0x41f   :  { %1776 = vmatprep.mubr.msk.f32.mxu1 %vm272_vm2, %v775_v30  ;;  %v1265_v30 = vld [vmem:[%s3330_s2 + $0x30] sm:$0xff]  ;;  %v1370_v45 = vld [vmem:[%s3330_s2 + $0x220] sm:$0xff] }
 0x420   :  { %v797_v27 = vpop.permute.xlu1 %796  ;;  %v2174_v35 = vpack.c.bf16 %v1372_v41, %v1370_v45  ;;  %v1374_v7 = vld [vmem:[%s3330_s2 + $0x240] sm:$0xff]  ;;  %v1490_v41 = vld [vmem:[%s3330_s2 + $0x78] sm:$0xff] }
 0x421   :  { %v790_v40 = vpop.permute.xlu0 %789 }
 0x422   :  { %v803_v54 = vsel %vm553_vm3, %v801_v24, %v790_v40  ;;  %v2142_v24 = vpack.c.bf16 %v1265_v30, %v1264_v53  ;;  %v2178_v53 = vpack.c.bf16 %v1376_v48, %v1374_v7  ;;  %v1294_v48 = vld [vmem:[%s3330_s2 + $0x314] ss:$0 sm:$0xff] }
 0x423   :  { %v805_v34 = vsel %vm560_vm4, %v803_v54, %v797_v27  ;;  %v1283_v27 = vld [vmem:[%s3330_s2 + $0x150] sm:$0xff]  ;;  %v1266_v54 = vld [vmem:[%s3330_s2 + $0x40] sm:$0xff] }
 0x424   :  { %944 = vmatmul.mubr.f32.gmra.mrb[18].mxu1 %v805_v34  ;;  %v2399_v37 = vpop.permute.xlu1 %2398  ;;  %v2144_v40 = vpack.c.bf16 %v1283_v27, %v1282_v21  ;;  %v1267_v34 = vld [vmem:[%s3330_s2 + $0x50] sm:$0xff]  ;;  %v1378_v21 = vld [vmem:[%s3330_s2 + $0x260] sm:$0xff] }
 0x425   :  { %v867_v43 = vpop.permute.xlu0 %866  ;;  %v2401_v55 = vunpack.i.h.bf16 %v2399_v37  ;;  %v2400_v6 = vunpack.i.l.bf16 %v2399_v37  ;;  %1966 = vmatprep.mubr.msk.f32.mxu1 %vm2538_vm5, %v2539_v61  ;;  %v1285_v37 = vld [vmem:[%s3330_s2 + $0x170] sm:$0xff] }
 0x426   :  { %v1380_v27 = vld [vmem:[%s3330_s2 + $0x270] sm:$0xff] }
 0x427   :  { %v2119_v59 = vpack.c.bf16 %v2401_v55, %v2400_v6  ;;  %v2146_v55 = vpack.c.bf16 %v1267_v34, %v1266_v54 }
 0x429   :  { %v2404_v23 = vpop.permute.xlu0 %2403  ;;  %2120 = vmatpush3.bf16.msra.mxu1 %v2119_v59  ;;  %v1269_v59 = vld [vmem:[%s3330_s2 + $0x70] sm:$0xff] }
 0x42a   :  { %v2406_v57 = vunpack.i.h.bf16 %v2404_v23  ;;  %v2405_v58 = vunpack.i.l.bf16 %v2404_v23  ;;  %2121 = vmatprep.subr.bf16.mxu1 %v2534_v51 }
 0x42c   :  { %v2122_v60 = vpack.c.bf16 %v2406_v57, %v2405_v58  ;;  %v1268_v58 = vld [vmem:[%s3330_s2 + $0x60] sm:$0xff] }
 0x42d   :  { %v980_v8 = vpop.permute.xlu0 %979 }
 0x42e   :  { %2123 = vmatpush3.bf16.msra.mxu1 %v2122_v60 }
 0x42f   :  { %2124 = vmatprep.subr.bf16.mxu1 %v2534_v51 }
 0x431   :  { %v2409_v31 = vpop.permute.xlu0 %2408 }
 0x432   :  { %v2411_v9 = vunpack.i.h.bf16 %v2409_v31  ;;  %v2410_v10 = vunpack.i.l.bf16 %v2409_v31  ;;  %v1289_v31 = vld [vmem:[%s3330_s2 + $0x1b0] sm:$0xff] }
 0x434   :  { %v2125_v38 = vpack.c.bf16 %v2411_v9, %v2410_v10  ;;  %v1272_v10 = vld [vmem:[%s3330_s2 + $0xa0] sm:$0xff] }
 0x4f1   :  { %v940_v62 = vpop.f32.mrb[16].mxu1 }
 0x4f2   :  { %v942_v63 = vpop.f32.mrb[17].mxu1  ;;  %v941_v25 = vadd.f32 %v940_v62, %v867_v43  ;;  %v2150_v62 = vpack.c.bf16 %v1269_v59, %v1268_v58 }
 0x4f3   :  { %v1155_v63 = vld [vmem:[%s3332_s1] sm:$0xff] }
 0x4f7   :  { %v945_v0 = vpop.f32.mrb[18].mxu1 }
 0x4f8   :  { %v946_v1 = vadd.f32 %v945_v0, %v867_v43  ;;  %v947_v2 = vpop.f32.mrb[19].mxu1  ;;  %v1284_v43 = vld [vmem:[%s3330_s2 + $0x160] sm:$0xff] }
 0x4f9   :  { %v2148_v57 = vpack.c.bf16 %v1285_v37, %v1284_v43  ;;  %v1286_v2 = vld [vmem:[%s3330_s2 + $0x180] sm:$0xff]  ;;  %v1779_v43 = vld [vmem:[%s3330_s2 + $0x312] ss:$8 sm:$0x3] }
 0x4fa   :  { %950 = vrot.lane.b32.xlu1 %v946_v1, %s2537_s0 }
 0x4fe   :  { %981 = vrot.lane.b32.xlu1 %v2961_v52, %s2537_s0 }
 0x502   :  { %2413 = vrot.lane.b32.xlu1 %v2412_v3, %s2531_s16  ;;  %s2540_s16 = smov 112   ;;  %v1287_v3 = vld [vmem:[%s3330_s2 + $0x190] sm:$0xff] }
 0x503   :  { %1079 = vrot.lane.b32.xlu0 %v2961_v52, %s2540_s16 }
 0x56c   :  { %v951_v29 = vpop.permute.xlu1 %950 }
 0x56d   :  { %v954_v4 = vsel %vm953_vm6, %v941_v25, %v951_v29  ;;  %v2152_v25 = vpack.c.bf16 %v1287_v3, %v1286_v2  ;;  %v1270_v29 = vld [vmem:[%s3330_s2 + $0x80] sm:$0xff]  ;;  %v1384_v2 = vld [vmem:[%s3330_s2 + $0x290] sm:$0xff] }
 0x56e   :  { %1967 = vmatmul.mubr.msk.f32.vlgmr.msra.gmra.mrb[20].mxu1 %vm272_vm2, %v954_v4  ;;  %v1271_v4 = vld [vmem:[%s3330_s2 + $0x90] sm:$0xff] }
 0x56f   :  { %1977 = vmatprep.mubr.msk.f32.mxu1 %vm2538_vm5, %v2539_v61  ;;  %2126 = vmatpush3.bf16.msra.mxu1 %v2125_v38  ;;  %v1291_v38 = vld [vmem:[%s3330_s2 + $0x1d0] sm:$0xff] }
 0x570   :  { %v982_v44 = vpop.permute.xlu1 %981  ;;  %2127 = vmatprep.subr.bf16.mxu1 %v2534_v51 }
 0x571   :  { %v983_v14 = vsel %vm953_vm6, %v980_v8, %v982_v44  ;;  %v2154_v8 = vpack.c.bf16 %v1271_v4, %v1270_v29  ;;  %v1288_v44 = vld [vmem:[%s3330_s2 + $0x1a0] sm:$0xff]  ;;  %v1389_v29 = vld [vmem:[%s3330_s2 + $0x2b8] sm:$0xff] }
 0x572   :  { %v2156_v9 = vpack.c.bf16 %v1289_v31, %v1288_v44  ;;  %v1388_v44 = vld [vmem:[%s3330_s2 + $0x2b0] sm:$0xff] }
 0x574   :  { %v2414_v56 = vpop.permute.xlu1 %2413 }
 0x575   :  { %v2416_v12 = vunpack.i.h.bf16 %v2414_v56  ;;  %v2415_v26 = vunpack.i.l.bf16 %v2414_v56  ;;  %v1080_v23 = vpop.permute.xlu0 %1079  ;;  %v1273_v56 = vld [vmem:[%s3330_s2 + $0xb0] sm:$0xff] }
 0x577   :  { %v2128_v13 = vpack.c.bf16 %v2416_v12, %v2415_v26  ;;  %v2158_v12 = vpack.c.bf16 %v1273_v56, %v1272_v10  ;;  %v1290_v26 = vld [vmem:[%s3330_s2 + $0x1c0] sm:$0xff]  ;;  %v1393_v10 = vld [vmem:[%s3330_s2 + $0x2d8] sm:$0xff] }
 0x578   :  { %v1390_v56 = vld [vmem:[%s3330_s2 + $0x2c0] sm:$0xff] }
 0x579   :  { %2129 = vmatpush3.bf16.msra.mxu1 %v2128_v13  ;;  %v1274_v13 = vld [vmem:[%s3330_s2 + $0xc0] sm:$0xff] }
 0x57a   :  { %2137 = vmatprep.subr.bf16.mxu1 %v2136_v47  ;;  %v2170_v47 = vpack.c.bf16 %v1368_v33, %v1366_v39  ;;  %v2204_v39 = vpack.c.bf16 %v1486_v28, %v1485_v19  ;;  %v1487_v33 = vld [vmem:[%s3330_s2 + $0x48] sm:$0xff] }
 0x641   :  { %v1054_v15 = vpop.f32.mrb[20].mxu1 }
 0x642   :  { %v1055_v16 = vadd.f32 %v1054_v15, %v983_v14  ;;  %v1968_v11 = vpop.f32.mrb[21].mxu1  ;;  %v2160_v14 = vpack.c.bf16 %v1291_v38, %v1290_v26  ;;  %v1275_v15 = vld [vmem:[%s3330_s2 + $0xd0] sm:$0xff]  ;;  %v1395_v38 = vld [vmem:[%s3330_s2 + $0x2e8] sm:$0xff] }
 0x643   :  { %v1293_v11 = vld [vmem:[%s3330_s2 + $0x1f0] sm:$0xff] }
 0x644   :  { %2519 = vtanh.f32 %v1055_v16  ;;  %v1292_v16 = vld [vmem:[%s3330_s2 + $0x1e0] sm:$0xff]  ;;  %v1392_v26 = vld [vmem:[%s3330_s2 + $0x2d0] sm:$0xff] }
 0x645   :  { %v2164_v18 = vpack.c.bf16 %v1293_v11, %v1292_v16  ;;  %v1394_v16 = vld [vmem:[%s3330_s2 + $0x2e0] sm:$0xff]  ;;  %v1396_v11 = vld [vmem:[%s3330_s2 + $0x2f0] sm:$0xff] }
 0x64e   :  { %v2520_v17 = vpop.eup %2519 }
 0x64f   :  { %1978 = vmatmul.mubr.msk.f32.vlgmr.msra.gmra.mrb[22].mxu1 %vm272_vm2, %v2520_v17  ;;  %v2162_v17 = vpack.c.bf16 %v1275_v15, %v1274_v13  ;;  %v1397_v13 = vld [vmem:[%s3330_s2 + $0x2f8] sm:$0xff] }
 0x650   :  { %2139 = vmatpush3.bf16.msra.mxu1 %v2138_v49  ;;  %v1379_v49 = vld [vmem:[%s3330_s2 + $0x268] sm:$0xff]  ;;  %v2196_v15 = vpack.c.bf16 %v1397_v13, %v1395_v38 }
 0x651   :  { %2141 = vmatprep.subr.bf16.mxu1 %v2140_v50  ;;  %v1381_v50 = vld [vmem:[%s3330_s2 + $0x278] sm:$0xff] }
 0x652   :  { %v2180_v30 = vpack.c.bf16 %v1381_v50, %v1379_v49 }
 0x654   :  { %2143 = vmatpush3.bf16.msra.mxu1 %v2142_v24  ;;  %v2182_v24 = vpack.c.bf16 %v1380_v27, %v1378_v21  ;;  %v1493_v21 = vld [vmem:[%s3330_s2 + $0xa8] sm:$0xff]  ;;  %v1494_v27 = vld [vmem:[%s3330_s2 + $0xb8] sm:$0xff] }
 0x655   :  { %2145 = vmatprep.subr.bf16.mxu1 %v2144_v40  ;;  %v1168_v40 = vlaneseq }
 0x657   :  { %v3130_v54 = vshrl.u32 %v1168_v40, 7  ;;  %v1495_v40 = vld [vmem:[%s3330_s2 + $0xc8] sm:$0xff] }
 0x658   :  { %2147 = vmatpush3.bf16.msra.mxu1 %v2146_v55 }
 0x659   :  { %2149 = vmatprep.subr.bf16.mxu1 %v2148_v57  ;;  %v1170_v34 = vsub.s32 0, %v3130_v54  ;;  %v1174_v37 = vsub.s32 1, %v3130_v54 }
 0x65b   :  { %v1175_v55 = vrot.slane %v1779_v43, %v1174_v37 }
 0x65c   :  { %2151 = vmatpush3.bf16.msra.mxu1 %v2150_v62  ;;  %v1383_v62 = vld [vmem:[%s3330_s2 + $0x288] sm:$0xff] }
 0x65d   :  { %2153 = vmatprep.subr.bf16.mxu1 %v2152_v25  ;;  %v1387_v25 = vld [vmem:[%s3330_s2 + $0x2a8] sm:$0xff] }
 0x65e   :  { %v2188_v4 = vpack.c.bf16 %v1389_v29, %v1387_v25  ;;  %v1579_v29 = vld [vmem:[%s3330_s2 + $0x188] sm:$0xff] }
 0x660   :  { %2155 = vmatpush3.bf16.msra.mxu1 %v2154_v8  ;;  %v1386_v8 = vld [vmem:[%s3330_s2 + $0x2a0] sm:$0xff] }
 0x661   :  { %2157 = vmatprep.subr.bf16.mxu1 %v2156_v9  ;;  %v2190_v31 = vpack.c.bf16 %v1388_v44, %v1386_v8  ;;  %v1391_v9 = vld [vmem:[%s3330_s2 + $0x2c8] sm:$0xff]  ;;  %v1582_v44 = vld [vmem:[%s3330_s2 + $0x1b8] sm:$0xff] }
 0x662   :  { %v1581_v8 = vld [vmem:[%s3330_s2 + $0x1a8] sm:$0xff] }
 0x664   :  { %2159 = vmatpush3.bf16.msra.mxu1 %v2158_v12  ;;  %v2192_v12 = vpack.c.bf16 %v1393_v10, %v1391_v9  ;;  %v2442_v9 = vpack.i.bf16 %v1582_v44, %v1581_v8  ;;  %v1583_v10 = vld [vmem:[%s3330_s2 + $0x1c8] sm:$0xff] }
 0x665   :  { %2161 = vmatprep.subr.bf16.mxu1 %v2160_v14  ;;  %v2194_v14 = vpack.c.bf16 %v1392_v26, %v1390_v56  ;;  %v1584_v56 = vld [vmem:[%s3330_s2 + $0x1d8] sm:$0xff] }
 0x666   :  { %v1586_v26 = vld [vmem:[%s3330_s2 + $0x1f8] sm:$0xff]  ;;  %v2447_v38 = vpack.i.bf16 %v1584_v56, %v1583_v10 }
 0x668   :  { %2163 = vmatpush3.bf16.msra.mxu1 %v2162_v17  ;;  %v2198_v17 = vpack.c.bf16 %v1396_v11, %v1394_v16 }
 0x669   :  { %2165 = vmatprep.subr.bf16.mxu1 %v2164_v18  ;;  %v1483_v18 = vld [vmem:[%s3330_s2 + $0x8] sm:$0xff] }
 0x66c   :  { %2167 = vmatpush3.bf16.msra.mxu1 %v2166_v20  ;;  %v2201_v20 = vpack.c.bf16 %v1484_v22, %v1483_v18 }
 0x66d   :  { %2200 = vmatprep.subr.bf16.mxu1 %v2534_v51 }
 0x722   :  { %v1151_v6 = vpop.f32.mrb[22].mxu1 }
 0x723   :  { %v1152_v60 = vadd.f32 %v1151_v6, %v1080_v23  ;;  %v1979_v32 = vpop.f32.mrb[23].mxu1  ;;  %v1171_v23 = vrot.slane %v1779_v43, %v1170_v34  ;;  %v1496_v43 = vld [vmem:[%s3330_s2 + $0xd8] sm:$0xff] }
 0x725   :  { %1157 = vrot.lane.b32.xlu1 %v1152_v60, %s2542_s28 }
 0x797   :  { %v1158_v0 = vpop.permute.xlu1 %1157 }
 0x798   :  { %v1160_v1 = vsel %vm35_vm0, %v1155_v63, %v1158_v0  ;;  %v1385_v63 = vld [vmem:[%s3330_s2 + $0x298] sm:$0xff] }
 0x799   :  { %1782 = vmatmul.mubr.msk.f32.vlgmr.msra.gmra.mrb[28].mxu0 %vm1178_vm10, %v1160_v1  ;;  %v2184_v0 = vpack.c.bf16 %v1385_v63, %v1383_v62  ;;  %v1382_v1 = vld [vmem:[%s3330_s2 + $0x280] sm:$0xff]  ;;  %v1575_v62 = vld [vmem:[%s3330_s2 + $0x148] sm:$0xff]  ;;  %v1576_v63 = vld [vmem:[%s3330_s2 + $0x158] sm:$0xff] }
 0x79a   :  { %1475 = vmatprep.mubr.f32.mxu0 %v2539_v61  ;;  %2171 = vmatpush1.bf16.msra.mxu0 %v2170_v47  ;;  %v2186_v3 = vpack.c.bf16 %v1384_v2, %v1382_v1  ;;  %v1489_v47 = vld [vmem:[%s3330_s2 + $0x68] sm:$0xff]  ;;  %v1578_v2 = vld [vmem:[%s3330_s2 + $0x178] sm:$0xff] }
 0x79b   :  { %2173 = vmatprep.subr.bf16.mxu0 %v2172_v46  ;;  %v1488_v46 = vld [vmem:[%s3330_s2 + $0x58] sm:$0xff]  ;;  %v2210_v42 = vpack.c.bf16 %v1490_v41, %v1489_v47  ;;  %v1577_v1 = vld [vmem:[%s3330_s2 + $0x168] sm:$0xff] }
 0x79c   :  { %v2207_v45 = vpack.c.bf16 %v1488_v46, %v1487_v33  ;;  %v2432_v25 = vpack.i.bf16 %v1578_v2, %v1577_v1 }
 0x79e   :  { %2175 = vmatpush1.bf16.msra.mxu0 %v2174_v35  ;;  %v1492_v35 = vld [vmem:[%s3330_s2 + $0x98] sm:$0xff] }
 0x79f   :  { %2177 = vmatprep.subr.bf16.mxu0 %v2176_v36  ;;  %v2213_v36 = vpack.c.bf16 %v1492_v35, %v1491_v5 }
 0x7a2   :  { %2179 = vmatpush1.bf16.msra.mxu0 %v2178_v53 }
 0x7a3   :  { %2181 = vmatprep.subr.bf16.mxu0 %v2180_v30 }
 0x7a6   :  { %2183 = vmatpush1.bf16.msra.mxu0 %v2182_v24  ;;  %v2216_v24 = vpack.c.bf16 %v1494_v27, %v1493_v21 }
 0x7a7   :  { %2185 = vmatprep.subr.bf16.mxu0 %v2184_v0 }
 0x7aa   :  { %2187 = vmatpush1.bf16.msra.mxu0 %v2186_v3  ;;  %v2427_v3 = vpack.i.bf16 %v1576_v63, %v1575_v62 }
 0x7ab   :  { %2189 = vmatprep.subr.bf16.mxu0 %v2188_v4  ;;  %v1580_v4 = vld [vmem:[%s3330_s2 + $0x198] sm:$0xff] }
 0x7ae   :  { %2191 = vmatpush1.bf16.msra.mxu0 %v2190_v31  ;;  %v2437_v31 = vpack.i.bf16 %v1580_v4, %v1579_v29 }
 0x7af   :  { %2193 = vmatprep.subr.bf16.mxu0 %v2192_v12  ;;  %v1585_v12 = vld [vmem:[%s3330_s2 + $0x1e8] sm:$0xff] }
 0x7b0   :  { %v2452_v13 = vpack.i.bf16 %v1586_v26, %v1585_v12 }
 0x7b2   :  { %2195 = vmatpush1.bf16.msra.mxu0 %v2194_v14  ;;  %v3303_v14 = vld [vmem:[%s3330_s2 + $0x313] ss:$8 sm:$0x3] }
 0x7b3   :  { %2197 = vmatprep.subr.bf16.mxu0 %v2196_v15  ;;  %v1404_v15 = vrot.slane %v3303_v14, %v1170_v34 }
 0x7b6   :  { %2199 = vmatpush1.bf16.msra.mxu0 %v2198_v17 }
 0x7b7   :  { %2224 = vmatprep.subr.bf16.mxu0 %v2534_v51 }
 0x86c   :  { %v1255_v6 = vpop.f32.mrb[28].mxu0 }
 0x86d   :  { %v1256_v57 = vadd.f32 %v1255_v6, %v1171_v23  ;;  %v1257_v58 = vpop.f32.mrb[29].mxu0  ;;  %v1497_v23 = vld [vmem:[%s3330_s2 + $0xe8] sm:$0xff] }
 0x86e   :  { %v1258_v59 = vadd.f32 %v1257_v58, %v1175_v55  ;;  %v1498_v55 = vld [vmem:[%s3330_s2 + $0xf8] sm:$0xff] }
 0x86f   :  { %v2222_v6 = vpack.c.bf16 %v1498_v55, %v1497_v23  ;;  %v1572_v58 = vld [vmem:[%s3330_s2 + $0x118] sm:$0xff] }
 0x870   :  { %2521 = vtanh.f32 %v1258_v59  ;;  %v1573_v59 = vld [vmem:[%s3330_s2 + $0x128] sm:$0xff] }
 0x871   :  { %2523 = vtanh.f32 %v1256_v57  ;;  %v1571_v57 = vld [vmem:[%s3330_s2 + $0x108] sm:$0xff] }
 0x87a   :  { %v2522_v60 = vpop.eup %2521 }
 0x87b   :  { %v2524_v32 = vpop.eup %2523  ;;  %1359 = vmatprep.mubr.f32.mxu1 %v2522_v60  ;;  %v2417_v60 = vpack.i.bf16 %v1572_v58, %v1571_v57 }
 0x87c   :  { %1360 = vmatmul.mubr.f32.vlgmr.msra.gmra.mrb[24].mxu1 %v2524_v32  ;;  %v1574_v32 = vld [vmem:[%s3330_s2 + $0x138] sm:$0xff] }
 0x87d   :  { %2012 = vmatprep.mubr.msk.f32.mxu1 %vm2538_vm5, %v2539_v61  ;;  %2202 = vmatpush3.bf16.msra.mxu1 %v2201_v20  ;;  %v2422_v0 = vpack.i.bf16 %v1574_v32, %v1573_v59  ;;  %v1499_v59 = vld [vmem:[%s3330_s2 + $0x31c] ss:$0 sm:$0xff] }
 0x87e   :  { %2203 = vmatprep.subr.bf16.mxu1 %v2534_v51  ;;  %2418 = vrot.lane.b32.xlu0 %v2417_v60, %s2543_s5 }
 0x87f   :  { %2423 = vrot.lane.b32.xlu1 %v2422_v0, %s2543_s5 }
 0x881   :  { %2205 = vmatpush3.bf16.msra.mxu1 %v2204_v39 }
 0x882   :  { %2206 = vmatprep.subr.bf16.mxu1 %v2534_v51  ;;  %2428 = vrot.lane.b32.xlu0 %v2427_v3, %s2543_s5 }
 0x883   :  { %2433 = vrot.lane.b32.xlu1 %v2432_v25, %s2543_s5 }
 0x885   :  { %2208 = vmatpush3.bf16.msra.mxu1 %v2207_v45 }
 0x886   :  { %2209 = vmatprep.subr.bf16.mxu1 %v2534_v51  ;;  %2438 = vrot.lane.b32.xlu0 %v2437_v31, %s2543_s5 }
 0x887   :  { %2443 = vrot.lane.b32.xlu1 %v2442_v9, %s2543_s5 }
 0x889   :  { %2211 = vmatpush3.bf16.msra.mxu1 %v2210_v42 }
 0x88a   :  { %2212 = vmatprep.subr.bf16.mxu1 %v2534_v51  ;;  %2448 = vrot.lane.b32.xlu0 %v2447_v38, %s2543_s5 }
 0x88b   :  { %2453 = vrot.lane.b32.xlu1 %v2452_v13, %s2543_s5 }
 0x88d   :  { %2214 = vmatpush3.bf16.msra.mxu1 %v2213_v36 }
 0x88e   :  { %2215 = vmatprep.subr.bf16.mxu1 %v2534_v51  ;;  %1651 = vrot.lane.b32.xlu0 %v2961_v52, %s2544_s21 }
 0x891   :  { %2217 = vmatpush3.bf16.msra.mxu1 %v2216_v24 }
 0x892   :  { %2218 = vmatprep.subr.bf16.mxu1 %v2534_v51 }
 0x8f0   :  { %v2419_v18 = vpop.permute.xlu0 %2418 }
 0x8f1   :  { %v2421_v22 = vunpack.i.h.bf16 %v2419_v18  ;;  %v2420_v19 = vunpack.i.l.bf16 %v2419_v18  ;;  %v2424_v20 = vpop.permute.xlu1 %2423 }
 0x8f2   :  { %v2426_v28 = vunpack.i.h.bf16 %v2424_v20  ;;  %v2425_v39 = vunpack.i.l.bf16 %v2424_v20 }
 0x8f3   :  { %v2225_v33 = vpack.c.bf16 %v2421_v22, %v2420_v19 }
 0x8f4   :  { %v2429_v46 = vpop.permute.xlu0 %2428  ;;  %v2228_v45 = vpack.c.bf16 %v2426_v28, %v2425_v39 }
 0x8f5   :  { %v2431_v47 = vunpack.i.h.bf16 %v2429_v46  ;;  %v2430_v41 = vunpack.i.l.bf16 %v2429_v46  ;;  %v2434_v34 = vpop.permute.xlu1 %2433 }
 0x8f6   :  { %v2436_v5 = vunpack.i.h.bf16 %v2434_v34  ;;  %v2435_v35 = vunpack.i.l.bf16 %v2434_v34 }
 0x8f7   :  { %v2231_v42 = vpack.c.bf16 %v2431_v47, %v2430_v41 }
 0x94f   :  { %v1863_v7 = vpop.f32.mrb[24].mxu1 }
 0x950   :  { %v1864_v49 = vpop.f32.mrb[25].mxu1 }
 0x951   :  { %v1865_v50 = vadd.f32 %v1864_v49, %v1863_v7  ;;  %v2439_v7 = vpop.permute.xlu0 %2438 }
 0x952   :  { %v2441_v49 = vunpack.i.h.bf16 %v2439_v7 }
 0x953   :  { %v1362_v53 = vadd.f32 %v1865_v50, %v1294_v48  ;;  %v2234_v48 = vpack.c.bf16 %v2436_v5, %v2435_v35  ;;  %v2440_v50 = vunpack.i.l.bf16 %v2439_v7 }
 0x955   :  { %2525 = vtanh.f32 %v1362_v53  ;;  %v2444_v53 = vpop.permute.xlu1 %2443 }
 0x956   :  { %v2446_v21 = vunpack.i.h.bf16 %v2444_v53  ;;  %v2445_v27 = vunpack.i.l.bf16 %v2444_v53 }
 0x958   :  { %v2240_v24 = vpack.c.bf16 %v2446_v21, %v2445_v27 }
 0x959   :  { %v2454_v23 = vpop.permute.xlu1 %2453 }
 0x95a   :  { %v2456_v55 = vunpack.i.h.bf16 %v2454_v23 }
 0x95f   :  { %v2526_v30 = vpop.eup %2525 }
 0x960   :  { %1476 = vmatmul.mubr.f32.vlgmr.msra.gmra.mrb[30].mxu0 %v2526_v30  ;;  %v2237_v30 = vpack.c.bf16 %v2441_v49, %v2440_v50 }
 0x961   :  { %2047 = vmatprep.mubr.msk.f32.mxu0 %vm2538_vm5, %v2539_v61  ;;  %v2219_v61 = vpack.c.bf16 %v1496_v43, %v1495_v40  ;;  %2226 = vmatpush3.bf16.msra.mxu0 %v2225_v33  ;;  %v2449_v40 = vpop.permute.xlu0 %2448 }
 0x962   :  { %2227 = vmatprep.subr.bf16.mxu0 %v2534_v51  ;;  %v2451_v43 = vunpack.i.h.bf16 %v2449_v40 }
 0x963   :  { %2220 = vmatpush3.bf16.msra.mxu1 %v2219_v61  ;;  %v2450_v61 = vunpack.i.l.bf16 %v2449_v40 }
 0x964   :  { %2221 = vmatprep.subr.bf16.mxu1 %v2534_v51 }
 0x965   :  { %2229 = vmatpush3.bf16.msra.mxu0 %v2228_v45  ;;  %v2243_v57 = vpack.c.bf16 %v2451_v43, %v2450_v61  ;;  %v1652_v0 = vpop.permute.xlu0 %1651 }
 0x966   :  { %2230 = vmatprep.subr.bf16.mxu0 %v2534_v51 }
 0x967   :  { %2223 = vmatpush3.bf16.msra.mxu1 %v2222_v6  ;;  %v2455_v6 = vunpack.i.l.bf16 %v2454_v23 }
 0x969   :  { %2232 = vmatpush3.bf16.msra.mxu0 %v2231_v42  ;;  %v2246_v58 = vpack.c.bf16 %v2456_v55, %v2455_v6 }
 0x96a   :  { %2233 = vmatprep.subr.bf16.mxu0 %v2534_v51 }
 0x96d   :  { %2235 = vmatpush3.bf16.msra.mxu0 %v2234_v48 }
 0x96e   :  { %2236 = vmatprep.subr.bf16.mxu0 %v2534_v51 }
 0x971   :  { %2238 = vmatpush3.bf16.msra.mxu0 %v2237_v30 }
 0x972   :  { %2239 = vmatprep.subr.bf16.mxu0 %v2534_v51 }
 0x975   :  { %2241 = vmatpush3.bf16.msra.mxu0 %v2240_v24 }
 0x976   :  { %2242 = vmatprep.subr.bf16.mxu0 %v2534_v51 }
 0x979   :  { %2244 = vmatpush3.bf16.msra.mxu0 %v2243_v57 }
 0x97a   :  { %2245 = vmatprep.subr.bf16.mxu0 %v2534_v51  ;;  %v1408_v51 = vrot.slane %v3303_v14, %v1174_v37 }
 0x97d   :  { %2247 = vmatpush3.bf16.msra.mxu0 %v2246_v58 }
 0xa33   :  { %v1477_v16 = vpop.f32.mrb[30].mxu0 }
 0xa34   :  { %v1478_v11 = vadd.f32 %v1477_v16, %v1404_v15  ;;  %v3308_v17 = vpop.f32.mrb[31].mxu0 }
 0xa35   :  { %v1480_v52 = vadd.f32 %v3308_v17, %v1408_v51 }
 0xa36   :  { %2527 = vtanh.f32 %v1478_v11 }
 0xa40   :  { %v2528_v36 = vpop.eup %2527 }
 0xa41   :  { %2013 = vmatmul.mubr.f32.vlgmr.msra.gmra.mrb[26].mxu1 %v2528_v36 }
 0xb14   :  { %v1566_v60 = vpop.f32.mrb[26].mxu1 }
 0xb15   :  { %v1567_v32 = vadd.f32 %v1566_v60, %v1499_v59  ;;  %v2014_v62 = vpop.f32.mrb[27].mxu1 }
 0xb17   :  { %2529 = vtanh.f32 %v1567_v32 }
 0xb21   :  { %v2530_v63 = vpop.eup %2529 }
 0xb22   :  { %2048 = vmatmul.mubr.f32.vlgmr.msra.gmra.mrb[32].mxu0 %v2530_v63 }
 0xbf5   :  { %v1720_v1 = vpop.f32.mrb[32].mxu0 }
 0xbf6   :  { %v1721_v2 = vadd.f32 %v1720_v1, %v1652_v0  ;;  %v2049_v3 = vpop.f32.mrb[33].mxu0 }
 0xbf8   :  { %1725 = vrot.lane.b32.xlu1 %v1721_v2, %s2542_s28 }
 0xc6a   :  { %v1726_v25 = vpop.permute.xlu1 %1725 }
 0xc6b   :  { %v1728_v29 = vsel %vm35_vm0, %v1480_v52, %v1726_v25 }
 0xc6c   :  { %v1730_v4 = vsel %vm1729_vm11, %v1728_v29, 0.0 }
 0xc6d   :  { %1731 = vst [vmem:[%s3333_s3] sm:$0xff] %v1730_v4 }

</bundles_post_ra>
